<compile_context>
chip_gen: v7x
topology: tpu7x:2x2x1
jax: 0.10.0
libtpu: 0.0.40
codegen_flags: <defaults>
</compile_context>

<pallas_src>
import functools

import jax
import jax.numpy as jnp
from jax.experimental import pallas as pl
from jax.experimental.pallas import tpu as pltpu


def mvcnn_kernel(p_total,
                 x_ref, wc_ref, bc_ref,
                 w1_ref, b1_ref, w2_ref, b2_ref, w3_ref, b3_ref,
                 o_ref, sum_ref, max_ref):
    """Grid = (views, P-tiles).

    x_ref   : (B, C, TP)  bf16   current view / spatial tile (lane-dense P)
    wc_ref  : (C, F, 1)   f32    1x1-conv weight (F on sublanes)
    bc_ref  : (F, 1)      f32    conv bias
    sum_ref : (B, F, 1)   f32    per-view sum_p ReLU(conv) accumulator
    max_ref : (B, F, 1)   f32    running max over views
    o_ref   : (B, NCp)    f32    classifier logits (lane-padded)
    """
    v = pl.program_id(0)
    t = pl.program_id(1)
    n_v = pl.num_programs(0)
    n_t = pl.num_programs(1)

    B, C, TP = x_ref.shape
    F_ = wc_ref.shape[1]

    # ---- init accumulators -------------------------------------------------
    @pl.when(t == 0)
    def _():
        sum_ref[...] = jnp.zeros_like(sum_ref)

    @pl.when(jnp.logical_and(v == 0, t == 0))
    def _():
        max_ref[...] = jnp.full_like(max_ref, -jnp.inf)

    # ---- per-view "features": 1x1 conv -> ReLU -> (partial) avg pool -------
    # Unrolled VPU broadcast-MAC over the <=4 input channels: z[b,f,p] =
    # sum_c wc[c,f] * x[b,c,p].  F sits on sublanes, P on lanes (dense).
    x = x_ref[...].astype(jnp.float32)                       # (B, C, TP)
    z = x[:, 0, :][:, None, :] * wc_ref[0][None, :, :]       # (B, F, TP)
    for c in range(1, C):
        z = z + x[:, c, :][:, None, :] * wc_ref[c][None, :, :]
    z = jnp.maximum(z + bc_ref[...][None, :, :], 0.0)
    sum_ref[...] += jnp.sum(z, axis=-1, keepdims=True)       # (B, F, 1)

    # ---- end of view: finish mean pool, take running max over views --------
    @pl.when(t == n_t - 1)
    def _():
        feat = sum_ref[...] * (1.0 / p_total)                # (B, F, 1)
        max_ref[...] = jnp.maximum(max_ref[...], feat)

    # ---- classifier MLP on the very last grid step --------------------------
    @pl.when(jnp.logical_and(v == n_v - 1, t == n_t - 1))
    def _():
        pooled = max_ref[...].reshape(B, F_).astype(jnp.bfloat16)   # (B, F)
        h1 = jnp.maximum(
            jnp.dot(pooled, w1_ref[...], preferred_element_type=jnp.float32)
            + b1_ref[...], 0.0)
        h2 = jnp.maximum(
            jnp.dot(h1.astype(jnp.bfloat16), w2_ref[...],
                    preferred_element_type=jnp.float32) + b2_ref[...], 0.0)
        o_ref[...] = (
            jnp.dot(h2.astype(jnp.bfloat16), w3_ref[...],
                    preferred_element_type=jnp.float32) + b3_ref[...]
        ).astype(o_ref.dtype)


def mvcnn_forward(x, params, *, tile_p=None):
    """x: (B, V, C, H, W) float32 (PyTorch layout). Returns (B, num_classes)."""
    B, V, C, H, W = x.shape
    P = H * W
    wc, bc, w1, b1, w2, b2, w3, b3 = params
    F_ = wc.shape[1]
    Hd = w1.shape[1]
    NC = w3.shape[1]

    if tile_p is None:
        tile_p = min(P, 512) if P % 128 == 0 else P
    assert P % tile_p == 0, (P, tile_p)
    num_pt = P // tile_p

    # Pad classifier output lane width to a multiple of 128 (unmasked stores).
    NCp = ((NC + 127) // 128) * 128
    w3p = jnp.zeros((Hd, NCp), w3.dtype).at[:, :NC].set(w3)
    b3p = jnp.zeros((1, NCp), b3.dtype).at[:, :NC].set(b3)

    # inputs.transpose(0, 1) -> views major; keep P lane-dense; bf16 for DMA.
    xv = (jnp.transpose(x, (1, 0, 2, 3, 4))
          .reshape(V, B, C, P)
          .astype(jnp.bfloat16))
    wc3 = wc.reshape(C, F_, 1)          # f32: used on the VPU
    bc2 = bc.reshape(F_, 1)             # f32
    w1b = w1.astype(jnp.bfloat16)
    w2b = w2.astype(jnp.bfloat16)
    w3b = w3p.astype(jnp.bfloat16)

    const2 = lambda v, t: (0, 0)
    const3 = lambda v, t: (0, 0, 0)

    out = pl.pallas_call(
        functools.partial(mvcnn_kernel, float(P)),
        out_shape=jax.ShapeDtypeStruct((B, NCp), jnp.float32),
        grid_spec=pltpu.PrefetchScalarGridSpec(
            num_scalar_prefetch=0,
            grid=(V, num_pt),
            in_specs=[
                pl.BlockSpec((pl.Squeezed(), B, C, tile_p),
                             lambda v, t: (v, 0, 0, t)),      # views / P tiles
                pl.BlockSpec((C, F_, 1), const3),             # conv weight
                pl.BlockSpec((F_, 1), const2),                # conv bias
                pl.BlockSpec((F_, Hd), const2),               # classifier W1
                pl.BlockSpec((1, Hd), const2),                # b1
                pl.BlockSpec((Hd, Hd), const2),               # W2
                pl.BlockSpec((1, Hd), const2),                # b2
                pl.BlockSpec((Hd, NCp), const2),              # W3 (padded)
                pl.BlockSpec((1, NCp), const2),               # b3 (padded)
            ],
            out_specs=pl.BlockSpec((B, NCp), const2),
            scratch_shapes=[
                pltpu.VMEM((B, F_, 1), jnp.float32),          # per-view sum
                pltpu.VMEM((B, F_, 1), jnp.float32),          # max over views
            ],
        ),
        compiler_params=pltpu.CompilerParams(
            # View axis carries the running max + last-step classifier and the
            # P axis carries the pooling accumulator -> both "arbitrary".
            dimension_semantics=("arbitrary", "arbitrary"),
            vmem_limit_bytes=32 * 1024 * 1024),
    )(xv, wc3, bc2, w1b, b1, w2b, b2, w3b, b3p)

    return out[:, :NC]


def mvcnn_reference(x, params):
    """Pure-JAX reference matching the kernel semantics (bf16 operands)."""
    B, V, C, H, W = x.shape
    wc, bc, w1, b1, w2, b2, w3, b3 = params
    hi = jax.lax.Precision.HIGHEST
    bf16 = jnp.bfloat16

    xb = x.astype(bf16).astype(jnp.float32)                 # same rounding as kernel
    xv = jnp.transpose(xb, (1, 0, 2, 3, 4)).reshape(V, B, C, H * W)
    y = jnp.einsum('vbcp,cf->vbfp', xv, wc, precision=hi) + bc.reshape(1, 1, -1, 1)
    y = jnp.maximum(y, 0.0)
    feat = jnp.mean(y, axis=-1)                             # (V, B, F)
    pooled = jnp.max(feat, axis=0)                          # (B, F)

    h1 = jnp.maximum(
        jnp.dot(pooled.astype(bf16), w1.astype(bf16),
                preferred_element_type=jnp.float32) + b1, 0.0)
    h2 = jnp.maximum(
        jnp.dot(h1.astype(bf16), w2.astype(bf16),
                preferred_element_type=jnp.float32) + b2, 0.0)
    return jnp.dot(h2.astype(bf16), w3.astype(bf16),
                   preferred_element_type=jnp.float32) + b3


def init_params(key, C, F_, Hd, NC):
    ks = jax.random.split(key, 8)
    s = lambda fan_in: 1.0 / jnp.sqrt(jnp.float32(fan_in))
    wc = jax.random.normal(ks[0], (C, F_), jnp.float32) * s(C)
    bc = jax.random.normal(ks[1], (1, F_), jnp.float32) * 0.01
    w1 = jax.random.normal(ks[2], (F_, Hd), jnp.float32) * s(F_)
    b1 = jax.random.normal(ks[3], (1, Hd), jnp.float32) * 0.01
    w2 = jax.random.normal(ks[4], (Hd, Hd), jnp.float32) * s(Hd)
    b2 = jax.random.normal(ks[5], (1, Hd), jnp.float32) * 0.01
    w3 = jax.random.normal(ks[6], (Hd, NC), jnp.float32) * s(Hd)
    b3 = jax.random.normal(ks[7], (1, NC), jnp.float32) * 0.01
    return (wc, bc, w1, b1, w2, b2, w3, b3)


if __name__ == "__main__":
    # Small stand-in shapes: batch=2, views=3, channels=4, spatial=16x16,
    # feature dim 128 (stand-in for fc_in_features=2048), hidden 128
    # (stand-in for 2048), num_classes=16 (stand-in for 1000).
    B, V, C, H, W = 2, 3, 4, 16, 16
    F_, Hd, NC = 128, 128, 16

    key = jax.random.PRNGKey(0)
    kx, kp = jax.random.split(key)
    x = jax.random.normal(kx, (B, V, C, H, W), jnp.float32)
    params = init_params(kp, C, F_, Hd, NC)

    # tile_p=128 so the P-tiling / accumulation path is exercised (P=256 -> 2 tiles).
    out = mvcnn_forward(x, params, tile_p=128)
    out = jax.block_until_ready(out)

    ref = mvcnn_reference(x, params)
    assert out.shape == (B, NC), out.shape
    err = float(jnp.max(jnp.abs(out - ref)))
    assert jnp.allclose(out, ref, atol=2e-4, rtol=2e-4), err

    print("KERNEL_OK")
</pallas_src>

<mosaic_0001>
module attributes {stable_mosaic.version = 11 : i64} {
  func.func @mvcnn_kernel(%arg0: i32, %arg1: i32, %arg2: memref<1x2x4x128xbf16, #tpu.memory_space<vmem>>, %arg3: memref<4x128x1xf32, #tpu.memory_space<vmem>>, %arg4: memref<128x1xf32, #tpu.memory_space<vmem>>, %arg5: memref<128x128xbf16, #tpu.memory_space<vmem>>, %arg6: memref<1x128xf32, #tpu.memory_space<vmem>>, %arg7: memref<128x128xbf16, #tpu.memory_space<vmem>>, %arg8: memref<1x128xf32, #tpu.memory_space<vmem>>, %arg9: memref<128x128xbf16, #tpu.memory_space<vmem>>, %arg10: memref<1x128xf32, #tpu.memory_space<vmem>>, %arg11: memref<2x128xf32, #tpu.memory_space<vmem>>, %arg12: memref<2x128x1xf32, #tpu.memory_space<vmem>>, %arg13: memref<2x128x1xf32, #tpu.memory_space<vmem>>) attributes {dimension_semantics = [#tpu.dimension_semantics<arbitrary>, #tpu.dimension_semantics<arbitrary>], iteration_bounds = array<i64: 3, 2>, scalar_prefetch = 0 : i64, scratch_operands = 2 : i64, tpu.core_type = #tpu.core_type<tc>, window_params = [{transform_indices = @transform_0, window_bounds = array<i64: 1, 2, 4, 128>}, {pipeline_mode = #tpu.pipeline_mode<synchronous>, transform_indices = @transform_1, window_bounds = array<i64: 4, 128, 1>}, {pipeline_mode = #tpu.pipeline_mode<synchronous>, transform_indices = @transform_2, window_bounds = array<i64: 128, 1>}, {pipeline_mode = #tpu.pipeline_mode<synchronous>, transform_indices = @transform_3, window_bounds = array<i64: 128, 128>}, {pipeline_mode = #tpu.pipeline_mode<synchronous>, transform_indices = @transform_4, window_bounds = array<i64: 1, 128>}, {pipeline_mode = #tpu.pipeline_mode<synchronous>, transform_indices = @transform_5, window_bounds = array<i64: 128, 128>}, {pipeline_mode = #tpu.pipeline_mode<synchronous>, transform_indices = @transform_6, window_bounds = array<i64: 1, 128>}, {pipeline_mode = #tpu.pipeline_mode<synchronous>, transform_indices = @transform_7, window_bounds = array<i64: 128, 128>}, {pipeline_mode = #tpu.pipeline_mode<synchronous>, transform_indices = @transform_8, window_bounds = array<i64: 1, 128>}, {pipeline_mode = #tpu.pipeline_mode<synchronous>, transform_indices = @transform_9, window_bounds = array<i64: 2, 128>}]} {
    %c0_i32 = arith.constant 0 : i32
    %0 = arith.cmpi eq, %arg1, %c0_i32 : i32
    %1 = arith.extui %0 : i1 to i32
    %c0_i32_0 = arith.constant 0 : i32
    %2 = arith.cmpi ne, %1, %c0_i32_0 : i32
    scf.if %2 {
      %cst_28 = arith.constant 0.000000e+00 : f32
      %69 = vector.broadcast %cst_28 : f32 to vector<2x128x1xf32>
      %c0_29 = arith.constant 0 : index
      %c0_30 = arith.constant 0 : index
      %c0_31 = arith.constant 0 : index
      %70 = vector.load %arg12[%c0_29, %c0_30, %c0_31] : memref<2x128x1xf32, #tpu.memory_space<vmem>>, vector<2x128x1xf32>
      tpu.vector_store %arg12[%c0_29, %c0_30, %c0_31], %69 {strides = array<i32>} : memref<2x128x1xf32, #tpu.memory_space<vmem>>, vector<2x128x1xf32>,
    } else {
    }
    %c0_i32_1 = arith.constant 0 : i32
    %3 = arith.cmpi eq, %arg0, %c0_i32_1 : i32
    %c0_i32_2 = arith.constant 0 : i32
    %4 = arith.cmpi eq, %arg1, %c0_i32_2 : i32
    %5 = arith.andi %3, %4 : i1
    %6 = arith.extui %5 : i1 to i32
    %c0_i32_3 = arith.constant 0 : i32
    %7 = arith.cmpi ne, %6, %c0_i32_3 : i32
    scf.if %7 {
      %cst_28 = arith.constant 0xFF800000 : f32
      %69 = vector.broadcast %cst_28 : f32 to vector<2x128x1xf32>
      %c0_29 = arith.constant 0 : index
      %c0_30 = arith.constant 0 : index
      %c0_31 = arith.constant 0 : index
      %70 = vector.load %arg13[%c0_29, %c0_30, %c0_31] : memref<2x128x1xf32, #tpu.memory_space<vmem>>, vector<2x128x1xf32>
      tpu.vector_store %arg13[%c0_29, %c0_30, %c0_31], %69 {strides = array<i32>} : memref<2x128x1xf32, #tpu.memory_space<vmem>>, vector<2x128x1xf32>,
    } else {
    }
    %c0 = arith.constant 0 : index
    %c0_4 = arith.constant 0 : index
    %c0_5 = arith.constant 0 : index
    %c0_6 = arith.constant 0 : index
    %8 = vector.load %arg2[%c0, %c0_4, %c0_5, %c0_6] : memref<1x2x4x128xbf16, #tpu.memory_space<vmem>>, vector<1x2x4x128xbf16>
    %9 = vector.shape_cast %8 : vector<1x2x4x128xbf16> to vector<2x4x128xbf16>
    %10 = arith.extf %9 : vector<2x4x128xbf16> to vector<2x4x128xf32>
    %11 = vector.extract_strided_slice %10 {offsets = [0, 0, 0], sizes = [2, 1, 128], strides = [1, 1, 1]} : vector<2x4x128xf32> to vector<2x1x128xf32>
    %12 = vector.shape_cast %11 : vector<2x1x128xf32> to vector<2x128xf32>
    %13 = vector.shape_cast %12 : vector<2x128xf32> to vector<2x1x128xf32>
    %c0_7 = arith.constant 0 : index
    %c0_8 = arith.constant 0 : index
    %c0_9 = arith.constant 0 : index
    %14 = vector.load %arg3[%c0_7, %c0_8, %c0_9] : memref<4x128x1xf32, #tpu.memory_space<vmem>>, vector<1x128x1xf32>
    %15 = vector.shape_cast %14 : vector<1x128x1xf32> to vector<128x1xf32>
    %16 = vector.shape_cast %15 : vector<128x1xf32> to vector<1x128x1xf32>
    %17 = vector.broadcast %13 : vector<2x1x128xf32> to vector<2x128x128xf32>
    %18 = vector.broadcast %16 : vector<1x128x1xf32> to vector<2x128x128xf32>
    %19 = arith.mulf %17, %18 : vector<2x128x128xf32>
    %20 = vector.extract_strided_slice %10 {offsets = [0, 1, 0], sizes = [2, 1, 128], strides = [1, 1, 1]} : vector<2x4x128xf32> to vector<2x1x128xf32>
    %21 = vector.shape_cast %20 : vector<2x1x128xf32> to vector<2x128xf32>
    %22 = vector.shape_cast %21 : vector<2x128xf32> to vector<2x1x128xf32>
    %c1 = arith.constant 1 : index
    %c0_10 = arith.constant 0 : index
    %c0_11 = arith.constant 0 : index
    %23 = vector.load %arg3[%c1, %c0_10, %c0_11] : memref<4x128x1xf32, #tpu.memory_space<vmem>>, vector<1x128x1xf32>
    %24 = vector.shape_cast %23 : vector<1x128x1xf32> to vector<128x1xf32>
    %25 = vector.shape_cast %24 : vector<128x1xf32> to vector<1x128x1xf32>
    %26 = vector.broadcast %22 : vector<2x1x128xf32> to vector<2x128x128xf32>
    %27 = vector.broadcast %25 : vector<1x128x1xf32> to vector<2x128x128xf32>
    %28 = arith.mulf %26, %27 : vector<2x128x128xf32>
    %29 = arith.addf %19, %28 : vector<2x128x128xf32>
    %30 = vector.extract_strided_slice %10 {offsets = [0, 2, 0], sizes = [2, 1, 128], strides = [1, 1, 1]} : vector<2x4x128xf32> to vector<2x1x128xf32>
    %31 = vector.shape_cast %30 : vector<2x1x128xf32> to vector<2x128xf32>
    %32 = vector.shape_cast %31 : vector<2x128xf32> to vector<2x1x128xf32>
    %c2 = arith.constant 2 : index
    %c0_12 = arith.constant 0 : index
    %c0_13 = arith.constant 0 : index
    %33 = vector.load %arg3[%c2, %c0_12, %c0_13] : memref<4x128x1xf32, #tpu.memory_space<vmem>>, vector<1x128x1xf32>
    %34 = vector.shape_cast %33 : vector<1x128x1xf32> to vector<128x1xf32>
    %35 = vector.shape_cast %34 : vector<128x1xf32> to vector<1x128x1xf32>
    %36 = vector.broadcast %32 : vector<2x1x128xf32> to vector<2x128x128xf32>
    %37 = vector.broadcast %35 : vector<1x128x1xf32> to vector<2x128x128xf32>
    %38 = arith.mulf %36, %37 : vector<2x128x128xf32>
    %39 = arith.addf %29, %38 : vector<2x128x128xf32>
    %40 = vector.extract_strided_slice %10 {offsets = [0, 3, 0], sizes = [2, 1, 128], strides = [1, 1, 1]} : vector<2x4x128xf32> to vector<2x1x128xf32>
    %41 = vector.shape_cast %40 : vector<2x1x128xf32> to vector<2x128xf32>
    %42 = vector.shape_cast %41 : vector<2x128xf32> to vector<2x1x128xf32>
    %c3 = arith.constant 3 : index
    %c0_14 = arith.constant 0 : index
    %c0_15 = arith.constant 0 : index
    %43 = vector.load %arg3[%c3, %c0_14, %c0_15] : memref<4x128x1xf32, #tpu.memory_space<vmem>>, vector<1x128x1xf32>
    %44 = vector.shape_cast %43 : vector<1x128x1xf32> to vector<128x1xf32>
    %45 = vector.shape_cast %44 : vector<128x1xf32> to vector<1x128x1xf32>
    %46 = vector.broadcast %42 : vector<2x1x128xf32> to vector<2x128x128xf32>
    %47 = vector.broadcast %45 : vector<1x128x1xf32> to vector<2x128x128xf32>
    %48 = arith.mulf %46, %47 : vector<2x128x128xf32>
    %49 = arith.addf %39, %48 : vector<2x128x128xf32>
    %c0_16 = arith.constant 0 : index
    %c0_17 = arith.constant 0 : index
    %50 = vector.load %arg4[%c0_16, %c0_17] : memref<128x1xf32, #tpu.memory_space<vmem>>, vector<128x1xf32>
    %51 = vector.shape_cast %50 : vector<128x1xf32> to vector<1x128x1xf32>
    %52 = vector.broadcast %51 : vector<1x128x1xf32> to vector<2x128x128xf32>
    %53 = arith.addf %49, %52 : vector<2x128x128xf32>
    %cst = arith.constant 0.000000e+00 : f32
    %54 = vector.broadcast %cst : f32 to vector<2x128x128xf32>
    %55 = arith.maximumf %53, %54 : vector<2x128x128xf32>
    %c0_18 = arith.constant 0 : index
    %c0_19 = arith.constant 0 : index
    %c0_20 = arith.constant 0 : index
    %56 = vector.load %arg12[%c0_18, %c0_19, %c0_20] : memref<2x128x1xf32, #tpu.memory_space<vmem>>, vector<2x128x1xf32>
    %cst_21 = arith.constant dense<0.000000e+00> : vector<2x128xf32>
    %57 = vector.multi_reduction <add>, %55, %cst_21 [2] : vector<2x128x128xf32> to vector<2x128xf32>
    %58 = vector.shape_cast %57 : vector<2x128xf32> to vector<2x128x1xf32>
    %59 = arith.addf %56, %58 : vector<2x128x1xf32>
    %c0_22 = arith.constant 0 : index
    %c0_23 = arith.constant 0 : index
    %c0_24 = arith.constant 0 : index
    %60 = vector.load %arg12[%c0_22, %c0_23, %c0_24] : memref<2x128x1xf32, #tpu.memory_space<vmem>>, vector<2x128x1xf32>
    tpu.vector_store %arg12[%c0_22, %c0_23, %c0_24], %59 {strides = array<i32>} : memref<2x128x1xf32, #tpu.memory_space<vmem>>, vector<2x128x1xf32>,
    %c1_i32 = arith.constant 1 : i32
    %61 = arith.cmpi eq, %arg1, %c1_i32 : i32
    %62 = arith.extui %61 : i1 to i32
    %c0_i32_25 = arith.constant 0 : i32
    %63 = arith.cmpi ne, %62, %c0_i32_25 : i32
    scf.if %63 {
      %c0_28 = arith.constant 0 : index
      %c0_29 = arith.constant 0 : index
      %c0_30 = arith.constant 0 : index
      %69 = vector.load %arg12[%c0_28, %c0_29, %c0_30] : memref<2x128x1xf32, #tpu.memory_space<vmem>>, vector<2x128x1xf32>
      %cst_31 = arith.constant 3.906250e-03 : f32
      %70 = vector.broadcast %cst_31 : f32 to vector<2x128x1xf32>
      %71 = arith.mulf %69, %70 : vector<2x128x1xf32>
      %c0_32 = arith.constant 0 : index
      %c0_33 = arith.constant 0 : index
      %c0_34 = arith.constant 0 : index
      %72 = vector.load %arg13[%c0_32, %c0_33, %c0_34] : memref<2x128x1xf32, #tpu.memory_space<vmem>>, vector<2x128x1xf32>
      %73 = arith.maximumf %72, %71 : vector<2x128x1xf32>
      %c0_35 = arith.constant 0 : index
      %c0_36 = arith.constant 0 : index
      %c0_37 = arith.constant 0 : index
      %74 = vector.load %arg13[%c0_35, %c0_36, %c0_37] : memref<2x128x1xf32, #tpu.memory_space<vmem>>, vector<2x128x1xf32>
      tpu.vector_store %arg13[%c0_35, %c0_36, %c0_37], %73 {strides = array<i32>} : memref<2x128x1xf32, #tpu.memory_space<vmem>>, vector<2x128x1xf32>,
    } else {
    }
    %c2_i32 = arith.constant 2 : i32
    %64 = arith.cmpi eq, %arg0, %c2_i32 : i32
    %c1_i32_26 = arith.constant 1 : i32
    %65 = arith.cmpi eq, %arg1, %c1_i32_26 : i32
    %66 = arith.andi %64, %65 : i1
    %67 = arith.extui %66 : i1 to i32
    %c0_i32_27 = arith.constant 0 : i32
    %68 = arith.cmpi ne, %67, %c0_i32_27 : i32
    scf.if %68 {
      %c0_28 = arith.constant 0 : index
      %c0_29 = arith.constant 0 : index
      %c0_30 = arith.constant 0 : index
      %69 = vector.load %arg13[%c0_28, %c0_29, %c0_30] : memref<2x128x1xf32, #tpu.memory_space<vmem>>, vector<2x128x1xf32>
      %70 = vector.shape_cast %69 : vector<2x128x1xf32> to vector<2x128xf32>
      %71 = arith.truncf %70 : vector<2x128xf32> to vector<2x128xbf16>
      %c0_31 = arith.constant 0 : index
      %c0_32 = arith.constant 0 : index
      %72 = vector.load %arg5[%c0_31, %c0_32] : memref<128x128xbf16, #tpu.memory_space<vmem>>, vector<128x128xbf16>
      %cst_33 = arith.constant dense<0.000000e+00> : vector<2x128xf32>
      %73 = tpu.matmul %71, %72, %cst_33 {dimension_numbers = #tpu.dot_dimension_numbers<[1], [0], [0], [1], [0, 0, 1, 1], [], []>} : vector<2x128xbf16>, vector<128x128xbf16>, vector<2x128xf32> -> vector<2x128xf32>
      %c0_34 = arith.constant 0 : index
      %c0_35 = arith.constant 0 : index
      %74 = vector.load %arg6[%c0_34, %c0_35] : memref<1x128xf32, #tpu.memory_space<vmem>>, vector<1x128xf32>
      %75 = vector.broadcast %74 : vector<1x128xf32> to vector<2x128xf32>
      %76 = arith.addf %73, %75 : vector<2x128xf32>
      %cst_36 = arith.constant 0.000000e+00 : f32
      %77 = vector.broadcast %cst_36 : f32 to vector<2x128xf32>
      %78 = arith.maximumf %76, %77 : vector<2x128xf32>
      %79 = arith.truncf %78 : vector<2x128xf32> to vector<2x128xbf16>
      %c0_37 = arith.constant 0 : index
      %c0_38 = arith.constant 0 : index
      %80 = vector.load %arg7[%c0_37, %c0_38] : memref<128x128xbf16, #tpu.memory_space<vmem>>, vector<128x128xbf16>
      %cst_39 = arith.constant dense<0.000000e+00> : vector<2x128xf32>
      %81 = tpu.matmul %79, %80, %cst_39 {dimension_numbers = #tpu.dot_dimension_numbers<[1], [0], [0], [1], [0, 0, 1, 1], [], []>} : vector<2x128xbf16>, vector<128x128xbf16>, vector<2x128xf32> -> vector<2x128xf32>
      %c0_40 = arith.constant 0 : index
      %c0_41 = arith.constant 0 : index
      %82 = vector.load %arg8[%c0_40, %c0_41] : memref<1x128xf32, #tpu.memory_space<vmem>>, vector<1x128xf32>
      %83 = vector.broadcast %82 : vector<1x128xf32> to vector<2x128xf32>
      %84 = arith.addf %81, %83 : vector<2x128xf32>
      %cst_42 = arith.constant 0.000000e+00 : f32
      %85 = vector.broadcast %cst_42 : f32 to vector<2x128xf32>
      %86 = arith.maximumf %84, %85 : vector<2x128xf32>
      %87 = arith.truncf %86 : vector<2x128xf32> to vector<2x128xbf16>
      %c0_43 = arith.constant 0 : index
      %c0_44 = arith.constant 0 : index
      %88 = vector.load %arg9[%c0_43, %c0_44] : memref<128x128xbf16, #tpu.memory_space<vmem>>, vector<128x128xbf16>
      %cst_45 = arith.constant dense<0.000000e+00> : vector<2x128xf32>
      %89 = tpu.matmul %87, %88, %cst_45 {dimension_numbers = #tpu.dot_dimension_numbers<[1], [0], [0], [1], [0, 0, 1, 1], [], []>} : vector<2x128xbf16>, vector<128x128xbf16>, vector<2x128xf32> -> vector<2x128xf32>
      %c0_46 = arith.constant 0 : index
      %c0_47 = arith.constant 0 : index
      %90 = vector.load %arg10[%c0_46, %c0_47] : memref<1x128xf32, #tpu.memory_space<vmem>>, vector<1x128xf32>
      %91 = vector.broadcast %90 : vector<1x128xf32> to vector<2x128xf32>
      %92 = arith.addf %89, %91 : vector<2x128xf32>
      %c0_48 = arith.constant 0 : index
      %c0_49 = arith.constant 0 : index
      %93 = vector.load %arg11[%c0_48, %c0_49] : memref<2x128xf32, #tpu.memory_space<vmem>>, vector<2x128xf32>
      tpu.vector_store %arg11[%c0_48, %c0_49], %92 {strides = array<i32>} : memref<2x128xf32, #tpu.memory_space<vmem>>, vector<2x128xf32>,
    } else {
    }
    return
  }
  func.func @transform_0(%arg0: i32, %arg1: i32) -> (i32, i32, i32, i32) {
    %c0_i32 = arith.constant 0 : i32
    %c0_i32_0 = arith.constant 0 : i32
    %c0_i32_1 = arith.constant 0 : i32
    return %arg0, %c0_i32, %c0_i32_0, %arg1 : i32, i32, i32, i32
  }
  func.func @transform_1(%arg0: i32, %arg1: i32) -> (i32, i32, i32) {
    %c0_i32 = arith.constant 0 : i32
    %c0_i32_0 = arith.constant 0 : i32
    %c0_i32_1 = arith.constant 0 : i32
    %c0_i32_2 = arith.constant 0 : i32
    return %c0_i32, %c0_i32_0, %c0_i32_1 : i32, i32, i32
  }
  func.func @transform_2(%arg0: i32, %arg1: i32) -> (i32, i32) {
    %c0_i32 = arith.constant 0 : i32
    %c0_i32_0 = arith.constant 0 : i32
    %c0_i32_1 = arith.constant 0 : i32
    return %c0_i32, %c0_i32_0 : i32, i32
  }
  func.func @transform_3(%arg0: i32, %arg1: i32) -> (i32, i32) {
    %c0_i32 = arith.constant 0 : i32
    %c0_i32_0 = arith.constant 0 : i32
    %c0_i32_1 = arith.constant 0 : i32
    return %c0_i32, %c0_i32_0 : i32, i32
  }
  func.func @transform_4(%arg0: i32, %arg1: i32) -> (i32, i32) {
    %c0_i32 = arith.constant 0 : i32
    %c0_i32_0 = arith.constant 0 : i32
    %c0_i32_1 = arith.constant 0 : i32
    return %c0_i32, %c0_i32_0 : i32, i32
  }
  func.func @transform_5(%arg0: i32, %arg1: i32) -> (i32, i32) {
    %c0_i32 = arith.constant 0 : i32
    %c0_i32_0 = arith.constant 0 : i32
    %c0_i32_1 = arith.constant 0 : i32
    return %c0_i32, %c0_i32_0 : i32, i32
  }
  func.func @transform_6(%arg0: i32, %arg1: i32) -> (i32, i32) {
    %c0_i32 = arith.constant 0 : i32
    %c0_i32_0 = arith.constant 0 : i32
    %c0_i32_1 = arith.constant 0 : i32
    return %c0_i32, %c0_i32_0 : i32, i32
  }
  func.func @transform_7(%arg0: i32, %arg1: i32) -> (i32, i32) {
    %c0_i32 = arith.constant 0 : i32
    %c0_i32_0 = arith.constant 0 : i32
    %c0_i32_1 = arith.constant 0 : i32
    return %c0_i32, %c0_i32_0 : i32, i32
  }
  func.func @transform_8(%arg0: i32, %arg1: i32) -> (i32, i32) {
    %c0_i32 = arith.constant 0 : i32
    %c0_i32_0 = arith.constant 0 : i32
    %c0_i32_1 = arith.constant 0 : i32
    return %c0_i32, %c0_i32_0 : i32, i32
  }
  func.func @transform_9(%arg0: i32, %arg1: i32) -> (i32, i32) {
    %c0_i32 = arith.constant 0 : i32
    %c0_i32_0 = arith.constant 0 : i32
    %c0_i32_1 = arith.constant 0 : i32
    return %c0_i32, %c0_i32_0 : i32, i32
  }
}

</mosaic_0001>

<bundles_post_ra>
// kernel: tpu_custom_call.1
= control target key start
LH: loop header
LB: loop body
LE: loop exit
PB: predicated region body
PF: predicated region fallthrough
CT: control target
= control target key end

     0   :  { %14 = vsyncpa [#allocation6], 0  ;;  %s2791_s30 = smov 0   ;;  %s2793_s10 = smov 0   ;;  %s4088_s0 = inlined_call_operand.vmem [shape: bf16[3,2,4,256], index: 0, kind: input, shape index: {}]   ;;  %s4089_s1 = inlined_call_operand.vmem [shape: f32[4,128,1], index: 1, kind: input, shape index: {}]   ;;  %s4090_s2 = inlined_call_operand.vmem [shape: f32[128,1], index: 2, kind: input, shape index: {}]   ;;  %s4091_s3 = inlined_call_operand.vmem [shape: bf16[128,128], index: 3, kind: input, shape index: {}]   ;;  %s4092_s4 = inlined_call_operand.vmem [shape: f32[1,128], index: 4, kind: input, shape index: {}]   ;;  %s4093_s5 = inlined_call_operand.vmem [shape: bf16[128,128], index: 5, kind: input, shape index: {}]   ;;  %s4094_s6 = inlined_call_operand.vmem [shape: f32[1,128], index: 6, kind: input, shape index: {}]   ;;  %s4095_s7 = inlined_call_operand.vmem [shape: bf16[128,128], index: 7, kind: input, shape index: {}]   ;;  %s4096_s8 = inlined_call_operand.vmem [shape: f32[1,128], index: 8, kind: input, shape index: {}]   ;;  %s4097_s9 = inlined_call_operand.hbm [shape: f32[2,128], index: 9, kind: output, shape index: {}]  }
   0x1   :  { %s2795_s11 = smov 0   ;;  %s2797_s12 = smov 0  }
   0x2   :  { %s2799_s13 = smov 0   ;;  %s2801_s14 = smov 0  }
   0x3   :  { %s2803_s15 = smov 0  }
   0x4 LB: > { %s29_s17 = sadd.s32 1, %s2724_s13  ;;  %s32_s18 = sadd.s32 1, %s2728_s14  ;;  %s2732_s15 = sphi %s2803_s15, %s20_s15   ;;  %s2728_s14 = sphi %s2801_s14, %s4181_s14   ;;  %s2724_s13 = sphi %s2799_s13, %s4180_s13   ;;  %s2720_s12 = sphi %s2797_s12, %s4179_s12   ;;  %s2716_s11 = sphi %s2795_s11, %s4178_s11   ;;  %s2712_s10 = sphi %s2793_s10, %s4177_s10   ;;  %s2708_s30 = sphi %s2791_s30, %s4176_s30  }
   0x5   : > { %p30_p0 = scmp.ge.s32.totalorder %s29_s17, 2  ;;  %p48_p1 = scmp.ne.s32.totalorder %s2712_s10, %s2708_s30 }
   0x6   : > { %p49_p2 = scmp.eq.s32.totalorder %s2732_s15, 0  ;;  %s41_s22 = sadd.s32 1, %s2712_s10 }
   0x7   : > { %s4183_s17 = smov (%p30_p0, %s29_s17), 0  ;;  %s4185_s18 = smov (!%p30_p0, %s32_s18), %s2728_s14 }
   0x8   : > { %p34_p3 = scmp.ge.s32.totalorder %s4185_s18, 3  ;;  %s37_s19 = ssub.s32 %s2724_s13, %s4183_s17 }
   0x9   : > { %p50_p4 = por %p49_p2, %p48_p1  ;;  %p2377_p6 = scmp.ge.s32.totalorder %s2732_s15, 6 }
   0xa   : > { %s4187_s18 = smov (%p34_p3, %s4185_s18), 0 }
   0xb   : > { %s36_s20 = ssub.s32 %s2728_s14, %s4187_s18  ;;  %287 = sbr.rel (%p2377_p6) target bundleno = 25 (0x19), region = 48 }
   0xc   : > { %s38_s21 = sor.u32 %s37_s19, %s36_s20 }
   0xd   : > { %p39_p5 = scmp.eq.s32.totalorder %s38_s21, 0 }
   0xf   : > { %s2843_s23 = scalar_select %p39_p5, %s2712_s10, %s41_s22  }
  0x12   : > { %290 = sbr.rel (!%p50_p4) target bundleno = 25 (0x19), region = 52  ;;  %s292_s24 = sand.u32 (%p50_p4), 1, %s2712_s10  }
  0x13   : > { %s2379_s25 = sshll.u32 (%p50_p4), %s2728_s14, 2  ;;  %s2378_s26 = sshll.u32 (%p50_p4), %s292_s24, 2 }
  0x14   : > { %s296_s27 = sadd.s32 (%p50_p4), %s2724_s13, %s2379_s25  ;;  %s294_s20 = scalar_lea.vmem (%p50_p4), [#allocation4], %s2378_s26 }
  0x15   : > { %s2380_s28 = sshll.u32 (%p50_p4), %s296_s27, 1 }
  0x16   : > { %s298_s19 = scalar_lea.vmem (%p50_p4), %s4088_s0, %s2380_s28 }
  0x17   : > { %v314_v0 = vld [vmem:[%s298_s19] sm:$0x3] (%p50_p4)  ;;  %v316_v1 = vld [vmem:[%s298_s19 + $0x4] sm:$0x3] (%p50_p4) }
  0x18   : > { %315 = vst [vmem:[%s294_s20] sm:$0x3] (%p50_p4), %v314_v0  ;;  %317 = vst [vmem:[%s294_s20 + $0x2] sm:$0x3] (%p50_p4), %v316_v1 }
  0x19 PF: > { %p2381_p7 = scmp.ge.s32.totalorder %s2732_s15, 1  ;;  %p335_p8 = scmp.lt.s32.totalorder %s2732_s15, 7 }
  0x1b   : > { %p336_p9 = pnand %p2381_p7, %p335_p8 }
  0x1d   : > { %339 = sbr.rel (%p336_p9) target bundleno = 1437 (0x59d), region = 86 }
  0x24   : > { %s342_s21 = sand.u32 1, %s2708_s30   ;;  %p373_p10 = scmp.eq.s32.totalorder %s2716_s11, 0 }
  0x25   : > { %s2856_s22 = sshll.u32 %s342_s21, 2  ;;  %p2383_p11 = scmp.ne.s32.totalorder %s2716_s11, 0 }
  0x26   : > { %s344_s16 = scalar_lea.vmem [#allocation4], %s2856_s22  ;;  %vm377_vm0 = vcmask (!%p2383_p11), 7168   ;;  %v2734_v2 = vmov (!%p2383_p11), 0.0  }
  0x27   : > { %376 = sbr.rel (%p2383_p11) target bundleno = 55 (0x37), region = 94  ;;  %378 = vst.msk [vmem:[#allocation2] sm:$0xff] (!%p2383_p11), %vm377_vm0, %v2734_v2  ;;  %379 = vst.msk [vmem:[#allocation2 + $0x8] sm:$0xff] (!%p2383_p11), %vm377_vm0, %v2734_v2 }
  0x28   : > { %380 = vst.msk [vmem:[#allocation2 + $0x10] sm:$0xff] (!%p2383_p11), %vm377_vm0, %v2734_v2  ;;  %381 = vst.msk [vmem:[#allocation2 + $0x18] sm:$0xff] (!%p2383_p11), %vm377_vm0, %v2734_v2 }
  0x29   : > { %382 = vst.msk [vmem:[#allocation2 + $0x20] sm:$0xff] (!%p2383_p11), %vm377_vm0, %v2734_v2  ;;  %383 = vst.msk [vmem:[#allocation2 + $0x28] sm:$0xff] (!%p2383_p11), %vm377_vm0, %v2734_v2 }
  0x2a   : > { %384 = vst.msk [vmem:[#allocation2 + $0x30] sm:$0xff] (!%p2383_p11), %vm377_vm0, %v2734_v2  ;;  %385 = vst.msk [vmem:[#allocation2 + $0x38] sm:$0xff] (!%p2383_p11), %vm377_vm0, %v2734_v2 }
  0x2b   : > { %386 = vst.msk [vmem:[#allocation2 + $0x40] sm:$0xff] (!%p2383_p11), %vm377_vm0, %v2734_v2  ;;  %387 = vst.msk [vmem:[#allocation2 + $0x48] sm:$0xff] (!%p2383_p11), %vm377_vm0, %v2734_v2 }
  0x2c   : > { %388 = vst.msk [vmem:[#allocation2 + $0x50] sm:$0xff] (!%p2383_p11), %vm377_vm0, %v2734_v2  ;;  %389 = vst.msk [vmem:[#allocation2 + $0x58] sm:$0xff] (!%p2383_p11), %vm377_vm0, %v2734_v2 }
  0x2d   : > { %390 = vst.msk [vmem:[#allocation2 + $0x60] sm:$0xff] (!%p2383_p11), %vm377_vm0, %v2734_v2  ;;  %391 = vst.msk [vmem:[#allocation2 + $0x68] sm:$0xff] (!%p2383_p11), %vm377_vm0, %v2734_v2 }
  0x2e   : > { %392 = vst.msk [vmem:[#allocation2 + $0x70] sm:$0xff] %vm377_vm0, %v2734_v2  ;;  %393 = vst.msk [vmem:[#allocation2 + $0x78] sm:$0xff] %vm377_vm0, %v2734_v2 }
  0x2f   : > { %394 = vst.msk [vmem:[#allocation2 + $0x80] sm:$0xff] %vm377_vm0, %v2734_v2  ;;  %395 = vst.msk [vmem:[#allocation2 + $0x88] sm:$0xff] %vm377_vm0, %v2734_v2 }
  0x30   : > { %396 = vst.msk [vmem:[#allocation2 + $0x90] sm:$0xff] %vm377_vm0, %v2734_v2  ;;  %397 = vst.msk [vmem:[#allocation2 + $0x98] sm:$0xff] %vm377_vm0, %v2734_v2 }
  0x31   : > { %398 = vst.msk [vmem:[#allocation2 + $0xa0] sm:$0xff] %vm377_vm0, %v2734_v2  ;;  %399 = vst.msk [vmem:[#allocation2 + $0xa8] sm:$0xff] %vm377_vm0, %v2734_v2 }
  0x32   : > { %400 = vst.msk [vmem:[#allocation2 + $0xb0] sm:$0xff] %vm377_vm0, %v2734_v2  ;;  %401 = vst.msk [vmem:[#allocation2 + $0xb8] sm:$0xff] %vm377_vm0, %v2734_v2 }
  0x33   : > { %402 = vst.msk [vmem:[#allocation2 + $0xc0] sm:$0xff] %vm377_vm0, %v2734_v2  ;;  %403 = vst.msk [vmem:[#allocation2 + $0xc8] sm:$0xff] %vm377_vm0, %v2734_v2 }
  0x34   : > { %404 = vst.msk [vmem:[#allocation2 + $0xd0] sm:$0xff] %vm377_vm0, %v2734_v2  ;;  %405 = vst.msk [vmem:[#allocation2 + $0xd8] sm:$0xff] %vm377_vm0, %v2734_v2 }
  0x35   : > { %406 = vst.msk [vmem:[#allocation2 + $0xe0] sm:$0xff] %vm377_vm0, %v2734_v2  ;;  %407 = vst.msk [vmem:[#allocation2 + $0xe8] sm:$0xff] %vm377_vm0, %v2734_v2 }
  0x36   : > { %408 = vst.msk [vmem:[#allocation2 + $0xf0] sm:$0xff] %vm377_vm0, %v2734_v2  ;;  %409 = vst.msk [vmem:[#allocation2 + $0xf8] sm:$0xff] %vm377_vm0, %v2734_v2 }
  0x37 PF: > { %p410_p12 = scmp.eq.s32.totalorder %s2720_s12, 0 }
  0x39   : > { %p411_p13 = pnand %p410_p12, %p373_p10 }
  0x3a   : > { %vm415_vm1 = vcmask (!%p411_p13), 7168   ;;  %v2735_v3 = vmov (!%p411_p13), -inf  }
  0x3b   : > { %414 = sbr.rel (%p411_p13) target bundleno = 75 (0x4b), region = 98  ;;  %416 = vst.msk [vmem:[#allocation3] sm:$0xff] (!%p411_p13), %vm415_vm1, %v2735_v3  ;;  %417 = vst.msk [vmem:[#allocation3 + $0x8] sm:$0xff] (!%p411_p13), %vm415_vm1, %v2735_v3 }
  0x3c   : > { %418 = vst.msk [vmem:[#allocation3 + $0x10] sm:$0xff] (!%p411_p13), %vm415_vm1, %v2735_v3  ;;  %419 = vst.msk [vmem:[#allocation3 + $0x18] sm:$0xff] (!%p411_p13), %vm415_vm1, %v2735_v3 }
  0x3d   : > { %420 = vst.msk [vmem:[#allocation3 + $0x20] sm:$0xff] (!%p411_p13), %vm415_vm1, %v2735_v3  ;;  %421 = vst.msk [vmem:[#allocation3 + $0x28] sm:$0xff] (!%p411_p13), %vm415_vm1, %v2735_v3 }
  0x3e   : > { %422 = vst.msk [vmem:[#allocation3 + $0x30] sm:$0xff] (!%p411_p13), %vm415_vm1, %v2735_v3  ;;  %423 = vst.msk [vmem:[#allocation3 + $0x38] sm:$0xff] (!%p411_p13), %vm415_vm1, %v2735_v3 }
  0x3f   : > { %424 = vst.msk [vmem:[#allocation3 + $0x40] sm:$0xff] (!%p411_p13), %vm415_vm1, %v2735_v3  ;;  %425 = vst.msk [vmem:[#allocation3 + $0x48] sm:$0xff] (!%p411_p13), %vm415_vm1, %v2735_v3 }
  0x40   : > { %426 = vst.msk [vmem:[#allocation3 + $0x50] sm:$0xff] (!%p411_p13), %vm415_vm1, %v2735_v3  ;;  %427 = vst.msk [vmem:[#allocation3 + $0x58] sm:$0xff] (!%p411_p13), %vm415_vm1, %v2735_v3 }
  0x41   : > { %428 = vst.msk [vmem:[#allocation3 + $0x60] sm:$0xff] (!%p411_p13), %vm415_vm1, %v2735_v3  ;;  %429 = vst.msk [vmem:[#allocation3 + $0x68] sm:$0xff] (!%p411_p13), %vm415_vm1, %v2735_v3 }
  0x42   : > { %430 = vst.msk [vmem:[#allocation3 + $0x70] sm:$0xff] %vm415_vm1, %v2735_v3  ;;  %431 = vst.msk [vmem:[#allocation3 + $0x78] sm:$0xff] %vm415_vm1, %v2735_v3 }
  0x43   : > { %432 = vst.msk [vmem:[#allocation3 + $0x80] sm:$0xff] %vm415_vm1, %v2735_v3  ;;  %433 = vst.msk [vmem:[#allocation3 + $0x88] sm:$0xff] %vm415_vm1, %v2735_v3 }
  0x44   : > { %434 = vst.msk [vmem:[#allocation3 + $0x90] sm:$0xff] %vm415_vm1, %v2735_v3  ;;  %435 = vst.msk [vmem:[#allocation3 + $0x98] sm:$0xff] %vm415_vm1, %v2735_v3 }
  0x45   : > { %436 = vst.msk [vmem:[#allocation3 + $0xa0] sm:$0xff] %vm415_vm1, %v2735_v3  ;;  %437 = vst.msk [vmem:[#allocation3 + $0xa8] sm:$0xff] %vm415_vm1, %v2735_v3 }
  0x46   : > { %438 = vst.msk [vmem:[#allocation3 + $0xb0] sm:$0xff] %vm415_vm1, %v2735_v3  ;;  %439 = vst.msk [vmem:[#allocation3 + $0xb8] sm:$0xff] %vm415_vm1, %v2735_v3 }
  0x47   : > { %440 = vst.msk [vmem:[#allocation3 + $0xc0] sm:$0xff] %vm415_vm1, %v2735_v3  ;;  %441 = vst.msk [vmem:[#allocation3 + $0xc8] sm:$0xff] %vm415_vm1, %v2735_v3 }
  0x48   : > { %442 = vst.msk [vmem:[#allocation3 + $0xd0] sm:$0xff] %vm415_vm1, %v2735_v3  ;;  %443 = vst.msk [vmem:[#allocation3 + $0xd8] sm:$0xff] %vm415_vm1, %v2735_v3 }
  0x49   : > { %444 = vst.msk [vmem:[#allocation3 + $0xe0] sm:$0xff] %vm415_vm1, %v2735_v3  ;;  %445 = vst.msk [vmem:[#allocation3 + $0xe8] sm:$0xff] %vm415_vm1, %v2735_v3 }
  0x4a   : > { %446 = vst.msk [vmem:[#allocation3 + $0xf0] sm:$0xff] %vm415_vm1, %v2735_v3  ;;  %447 = vst.msk [vmem:[#allocation3 + $0xf8] sm:$0xff] %vm415_vm1, %v2735_v3 }
  0x4b PF: > { %v454_v4 = vld [vmem:[%s4089_s1 + $0x10] sm:$0xff]  ;;  %v452_v5 = vld [vmem:[%s4089_s1] sm:$0xff]  ;;  %v2736_v6 = vmov 0   ;;  %v455_v7 = vld [vmem:[%s4089_s1 + $0x18] sm:$0xff]  ;;  %p1416_p0 = scmp.eq.s32.totalorder %s2716_s11, 1  ;;  %vm1383_vm2 = vcmask 7168  }
  0x4c   : > { %2621 = vset.pattern.permute.xlu1 %v2736_v6  ;;  %2620 = vset.pattern.permute.xlu0 %v2736_v6  ;;  %v453_v8 = vld [vmem:[%s4089_s1 + $0x8] sm:$0xff]  ;;  %v456_v10 = vld [vmem:[%s4089_s1 + $0x20] sm:$0xff]  ;;  %v459_v11 = vld [vmem:[%s4089_s1 + $0x38] sm:$0xff]  ;;  %p2432_p1 = scmp.ne.s32.totalorder %s2716_s11, 1 }
  0x4d   : > { %488 = vperm.xlu1 %2621, %v454_v4   ;;  %478 = vperm.xlu0 %2620, %v452_v5   ;;  %v457_v9 = vld [vmem:[%s4089_s1 + $0x28] sm:$0xff]  ;;  %v458_v12 = vld [vmem:[%s4089_s1 + $0x30] sm:$0xff]  ;;  %v460_v14 = vld [vmem:[%s4089_s1 + $0x40] sm:$0xff] }
  0x4e   : > { %v461_v13 = vld [vmem:[%s4089_s1 + $0x48] sm:$0xff]  ;;  %v463_v15 = vld [vmem:[%s4089_s1 + $0x58] sm:$0xff]  ;;  %v462_v16 = vld [vmem:[%s4089_s1 + $0x50] sm:$0xff] }
  0x4f   : > { %v465_v17 = vld [vmem:[%s4089_s1 + $0x68] sm:$0xff]  ;;  %v464_v18 = vld [vmem:[%s4089_s1 + $0x60] sm:$0xff]  ;;  %v467_v19 = vld [vmem:[%s4089_s1 + $0x78] sm:$0xff] }
  0x50   : > { %v466_v20 = vld [vmem:[%s4089_s1 + $0x70] sm:$0xff]  ;;  %v2385_v21 = vld [vmem:[%s4089_s1 + $0x88] sm:$0xff]  ;;  %v2384_v22 = vld [vmem:[%s4089_s1 + $0x80] sm:$0xff] }
  0x51   : > { %493 = vperm.xlu1 %2621, %v455_v7   ;;  %483 = vperm.xlu0 %2620, %v453_v8   ;;  %v2387_v23 = vld [vmem:[%s4089_s1 + $0x98] sm:$0xff]  ;;  %v2386_v24 = vld [vmem:[%s4089_s1 + $0x90] sm:$0xff]  ;;  %v2389_v25 = vld [vmem:[%s4089_s1 + $0xa8] sm:$0xff] }
  0x52   : > { %v2388_v26 = vld [vmem:[%s4089_s1 + $0xa0] sm:$0xff]  ;;  %v2391_v27 = vld [vmem:[%s4089_s1 + $0xb8] sm:$0xff]  ;;  %v2390_v28 = vld [vmem:[%s4089_s1 + $0xb0] sm:$0xff] }
  0x53   : > { %v2393_v29 = vld [vmem:[%s4089_s1 + $0xc8] sm:$0xff]  ;;  %v2392_v30 = vld [vmem:[%s4089_s1 + $0xc0] sm:$0xff]  ;;  %v2395_v31 = vld [vmem:[%s4089_s1 + $0xd8] sm:$0xff] }
  0x54   : > { %v2394_v32 = vld [vmem:[%s4089_s1 + $0xd0] sm:$0xff]  ;;  %v2397_v33 = vld [vmem:[%s4089_s1 + $0xe8] sm:$0xff]  ;;  %v2396_v34 = vld [vmem:[%s4089_s1 + $0xe0] sm:$0xff] }
  0x55   : > { %503 = vperm.xlu1 %2621, %v457_v9   ;;  %498 = vperm.xlu0 %2620, %v456_v10   ;;  %v2399_v35 = vld [vmem:[%s4089_s1 + $0xf8] sm:$0xff]  ;;  %v2398_v36 = vld [vmem:[%s4089_s1 + $0xf0] sm:$0xff]  ;;  %v2401_v37 = vld [vmem:[%s4089_s1 + $0x108] sm:$0xff] }
  0x56   : > { %v2400_v38 = vld [vmem:[%s4089_s1 + $0x100] sm:$0xff]  ;;  %v2403_v39 = vld [vmem:[%s4089_s1 + $0x118] sm:$0xff]  ;;  %v2402_v40 = vld [vmem:[%s4089_s1 + $0x110] sm:$0xff] }
  0x57   : > { %v2405_v41 = vld [vmem:[%s4089_s1 + $0x128] sm:$0xff]  ;;  %v2404_v42 = vld [vmem:[%s4089_s1 + $0x120] sm:$0xff]  ;;  %v2407_v43 = vld [vmem:[%s4089_s1 + $0x138] sm:$0xff] }
  0x58   : > { %v2406_v44 = vld [vmem:[%s4089_s1 + $0x130] sm:$0xff]  ;;  %v2409_v45 = vld [vmem:[%s4089_s1 + $0x148] sm:$0xff]  ;;  %v2408_v46 = vld [vmem:[%s4089_s1 + $0x140] sm:$0xff] }
  0x59   : > { %513 = vperm.xlu1 %2621, %v459_v11   ;;  %508 = vperm.xlu0 %2620, %v458_v12   ;;  %v2411_v47 = vld [vmem:[%s4089_s1 + $0x158] sm:$0xff]  ;;  %v2410_v48 = vld [vmem:[%s4089_s1 + $0x150] sm:$0xff]  ;;  %v2413_v49 = vld [vmem:[%s4089_s1 + $0x168] sm:$0xff] }
  0x5a   : > { %v2412_v50 = vld [vmem:[%s4089_s1 + $0x160] sm:$0xff]  ;;  %v2415_v51 = vld [vmem:[%s4089_s1 + $0x178] sm:$0xff]  ;;  %v2414_v52 = vld [vmem:[%s4089_s1 + $0x170] sm:$0xff] }
  0x5b   : > { %v2417_v53 = vld [vmem:[%s4089_s1 + $0x188] sm:$0xff]  ;;  %v2416_v54 = vld [vmem:[%s4089_s1 + $0x180] sm:$0xff]  ;;  %v2419_v55 = vld [vmem:[%s4089_s1 + $0x198] sm:$0xff] }
  0x5c   : > { %v2418_v56 = vld [vmem:[%s4089_s1 + $0x190] sm:$0xff]  ;;  %v2421_v57 = vld [vmem:[%s4089_s1 + $0x1a8] sm:$0xff]  ;;  %v2420_v58 = vld [vmem:[%s4089_s1 + $0x1a0] sm:$0xff] }
  0x5d   : > { %523 = vperm.xlu1 %2621, %v461_v13   ;;  %518 = vperm.xlu0 %2620, %v460_v14   ;;  %v2423_v59 = vld [vmem:[%s4089_s1 + $0x1b8] sm:$0xff]  ;;  %v2422_v60 = vld [vmem:[%s4089_s1 + $0x1b0] sm:$0xff]  ;;  %v2425_v61 = vld [vmem:[%s4089_s1 + $0x1c8] sm:$0xff] }
  0x5e   : > { %v2424_v62 = vld [vmem:[%s4089_s1 + $0x1c0] sm:$0xff]  ;;  %v2427_v63 = vld [vmem:[%s4089_s1 + $0x1d8] sm:$0xff]  ;;  %v2426_v0 = vld [vmem:[%s4089_s1 + $0x1d0] sm:$0xff] }
  0x5f   : > { %v2429_v1 = vld [vmem:[%s4089_s1 + $0x1e8] sm:$0xff]  ;;  %v2428_v2 = vld [vmem:[%s4089_s1 + $0x1e0] sm:$0xff]  ;;  %v2431_v3 = vld [vmem:[%s4089_s1 + $0x1f8] sm:$0xff] }
  0x60   : > { %v2430_v4 = vld [vmem:[%s4089_s1 + $0x1f0] sm:$0xff]  ;;  %v1096_v5 = vld [vmem:[%s4090_s2 + $0x8] sm:$0xff]  ;;  %v1095_v6 = vld [vmem:[%s4090_s2] sm:$0xff] }
  0x61   : > { %533 = vperm.xlu1 %2621, %v463_v15   ;;  %528 = vperm.xlu0 %2620, %v462_v16   ;;  %v1098_v9 = vld [vmem:[%s4090_s2 + $0x18] sm:$0xff]  ;;  %v1097_v10 = vld [vmem:[%s4090_s2 + $0x10] sm:$0xff]  ;;  %v1100_v13 = vld [vmem:[%s4090_s2 + $0x28] sm:$0xff] }
  0x62   : > { %v1099_v14 = vld [vmem:[%s4090_s2 + $0x20] sm:$0xff] }
  0x65   : > { %543 = vperm.xlu1 %2621, %v465_v17   ;;  %538 = vperm.xlu0 %2620, %v464_v18   ;;  %v1102_v17 = vld [vmem:[%s4090_s2 + $0x38] sm:$0xff]  ;;  %v1101_v18 = vld [vmem:[%s4090_s2 + $0x30] sm:$0xff] }
  0x69   : > { %553 = vperm.xlu1 %2621, %v467_v19   ;;  %548 = vperm.xlu0 %2620, %v466_v20  }
  0x6d   : > { %620 = vperm.xlu1 %2621, %v2385_v21   ;;  %615 = vperm.xlu0 %2620, %v2384_v22   ;;  %v1104_v21 = vld [vmem:[%s4090_s2 + $0x48] sm:$0xff]  ;;  %v1103_v22 = vld [vmem:[%s4090_s2 + $0x40] sm:$0xff] }
  0x71   : > { %630 = vperm.xlu1 %2621, %v2387_v23   ;;  %625 = vperm.xlu0 %2620, %v2386_v24  }
  0x75   : > { %640 = vperm.xlu1 %2621, %v2389_v25   ;;  %635 = vperm.xlu0 %2620, %v2388_v26   ;;  %v1106_v25 = vld [vmem:[%s4090_s2 + $0x58] sm:$0xff]  ;;  %v1105_v26 = vld [vmem:[%s4090_s2 + $0x50] sm:$0xff] }
  0x79   : > { %650 = vperm.xlu1 %2621, %v2391_v27   ;;  %645 = vperm.xlu0 %2620, %v2390_v28  }
  0x7d   : > { %660 = vperm.xlu1 %2621, %v2393_v29   ;;  %655 = vperm.xlu0 %2620, %v2392_v30   ;;  %v1108_v29 = vld [vmem:[%s4090_s2 + $0x68] sm:$0xff]  ;;  %v1107_v30 = vld [vmem:[%s4090_s2 + $0x60] sm:$0xff] }
  0x81   : > { %670 = vperm.xlu1 %2621, %v2395_v31   ;;  %665 = vperm.xlu0 %2620, %v2394_v32  }
  0x85   : > { %680 = vperm.xlu1 %2621, %v2397_v33   ;;  %675 = vperm.xlu0 %2620, %v2396_v34   ;;  %v1110_v33 = vld [vmem:[%s4090_s2 + $0x78] sm:$0xff]  ;;  %v1109_v34 = vld [vmem:[%s4090_s2 + $0x70] sm:$0xff] }
  0x89   : > { %690 = vperm.xlu1 %2621, %v2399_v35   ;;  %685 = vperm.xlu0 %2620, %v2398_v36  }
  0x8d   : > { %789 = vperm.xlu1 %2621, %v2401_v37   ;;  %784 = vperm.xlu0 %2620, %v2400_v38  }
  0x91   : > { %799 = vperm.xlu1 %2621, %v2403_v39   ;;  %794 = vperm.xlu0 %2620, %v2402_v40  }
  0x95   : > { %809 = vperm.xlu1 %2621, %v2405_v41   ;;  %804 = vperm.xlu0 %2620, %v2404_v42  }
  0x99   : > { %819 = vperm.xlu1 %2621, %v2407_v43   ;;  %814 = vperm.xlu0 %2620, %v2406_v44   ;;  %v4098_v43 = vlaneseq }
  0x9d   : > { %829 = vperm.xlu1 %2621, %v2409_v45   ;;  %824 = vperm.xlu0 %2620, %v2408_v46   ;;  %v3212_v46 = vshrl.u32 %v4098_v43, 7 }
  0x9f   : > { %4115 = vst [vmem:[#allocation9_spill] sm:$0xff] %v3212_v46 }
  0xa1   : > { %839 = vperm.xlu1 %2621, %v2411_v47   ;;  %834 = vperm.xlu0 %2620, %v2410_v48   ;;  %v448_v47 = vld [vmem:[%s344_s16] sm:$0x3]  ;;  %v449_v48 = vld [vmem:[%s344_s16 + $0x2] sm:$0x3] }
  0xa5   : > { %849 = vperm.xlu1 %2621, %v2413_v49   ;;  %844 = vperm.xlu0 %2620, %v2412_v50  }
  0xa9   : > { %859 = vperm.xlu1 %2621, %v2415_v51   ;;  %854 = vperm.xlu0 %2620, %v2414_v52   ;;  %v470_v51 = vsub.s32 0, %v3212_v46  ;;  %v3223_v52 = vunpack.c.l.bf16 %v448_v47 }
  0xad   : > { %958 = vperm.xlu1 %2621, %v2417_v53   ;;  %953 = vperm.xlu0 %2620, %v2416_v54   ;;  %v3225_v53 = vunpack.c.l.bf16 %v449_v48  ;;  %v607_v54 = vsub.s32 1, %v3212_v46 }
  0xb1   : > { %968 = vperm.xlu1 %2621, %v2419_v55   ;;  %963 = vperm.xlu0 %2620, %v2418_v56  }
  0xb5   : > { %978 = vperm.xlu1 %2621, %v2421_v57   ;;  %973 = vperm.xlu0 %2620, %v2420_v58   ;;  %v3233_v57 = vrot.slane %v3223_v52, %v470_v51  ;;  %v3236_v58 = vrot.slane %v3225_v53, %v470_v51 }
  0xb9   : > { %988 = vperm.xlu1 %2621, %v2423_v59   ;;  %983 = vperm.xlu0 %2620, %v2422_v60   ;;  %v3239_v59 = vrot.slane %v3223_v52, %v607_v54  ;;  %v3242_v60 = vrot.slane %v3225_v53, %v607_v54 }
  0xbd   : > { %998 = vperm.xlu1 %2621, %v2425_v61   ;;  %993 = vperm.xlu0 %2620, %v2424_v62  }
  0xc1   : > { %1008 = vperm.xlu1 %2621, %v2427_v63   ;;  %1003 = vperm.xlu0 %2620, %v2426_v0   ;;  %v4099_v63 = vsub.s32 2, %v3212_v46 }
  0xc5   : > { %1018 = vperm.xlu1 %2621, %v2429_v1   ;;  %1013 = vperm.xlu0 %2620, %v2428_v2  }
  0xc9   : > { %1028 = vperm.xlu1 %2621, %v2431_v3   ;;  %1023 = vperm.xlu0 %2620, %v2430_v4  }
  0xcc   : > { %v3125_v7 = vpop.permute.xlu1 %488  ;;  %v3127_v8 = vpop.permute.xlu0 %478 }
  0xcd   : > { %1118 = vperm.xlu1 %2621, %v1096_v5   ;;  %1113 = vperm.xlu0 %2620, %v1095_v6  }
  0xd0   : > { %v3135_v11 = vpop.permute.xlu1 %493  ;;  %v3137_v12 = vpop.permute.xlu0 %483 }
  0xd1   : > { %1128 = vperm.xlu1 %2621, %v1098_v9   ;;  %1123 = vperm.xlu0 %2620, %v1097_v10  }
  0xd4   : > { %v3145_v15 = vpop.permute.xlu1 %503  ;;  %v3147_v16 = vpop.permute.xlu0 %498 }
  0xd5   : > { %1138 = vperm.xlu1 %2621, %v1100_v13   ;;  %1133 = vperm.xlu0 %2620, %v1099_v14   ;;  %v3263_v14 = vrot.slane %v3225_v53, %v4099_v63 }
  0xd8   : > { %v3155_v19 = vpop.permute.xlu1 %513  ;;  %v3157_v20 = vpop.permute.xlu0 %508 }
  0xd9   : > { %1148 = vperm.xlu1 %2621, %v1102_v17   ;;  %1143 = vperm.xlu0 %2620, %v1101_v18  }
  0xdc   : > { %v3165_v23 = vpop.permute.xlu1 %523  ;;  %v3167_v24 = vpop.permute.xlu0 %518 }
  0xdd   : > { %1158 = vperm.xlu1 %2621, %v1104_v21   ;;  %1153 = vperm.xlu0 %2620, %v1103_v22  }
  0xe0   : > { %v3175_v27 = vpop.permute.xlu1 %533  ;;  %v3177_v28 = vpop.permute.xlu0 %528 }
  0xe1   : > { %1168 = vperm.xlu1 %2621, %v1106_v25   ;;  %1163 = vperm.xlu0 %2620, %v1105_v26   ;;  %v573_v25 = vmul.f32 %v3137_v12, %v3236_v58  ;;  %v572_v26 = vmul.f32 %v3127_v8, %v3236_v58 }
  0xe4   : > { %v544_v31 = vpop.permute.xlu1 %543  ;;  %v3185_v32 = vpop.permute.xlu0 %538 }
  0xe5   : > { %1178 = vperm.xlu1 %2621, %v1108_v29   ;;  %1173 = vperm.xlu0 %2620, %v1107_v30   ;;  %v569_v0 = vmul.f32 %v544_v31, %v3233_v57  ;;  %v585_v1 = vmul.f32 %v544_v31, %v3236_v58 }
  0xe8   : > { %v554_v35 = vpop.permute.xlu1 %553  ;;  %v3193_v36 = vpop.permute.xlu0 %548 }
  0xe9   : > { %4114 = vst [vmem:[#allocation8_spill] sm:$0xff] %v3193_v36  ;;  %1188 = vperm.xlu1 %2621, %v1110_v33   ;;  %1183 = vperm.xlu0 %2620, %v1109_v34   ;;  %v571_v6 = vmul.f32 %v554_v35, %v3233_v57  ;;  %v587_v17 = vmul.f32 %v554_v35, %v3236_v58 }
  0xec   : > { %v3195_v37 = vpop.permute.xlu1 %620  ;;  %v3197_v38 = vpop.permute.xlu0 %615 }
  0xed   : > { %v710_v9 = vmul.f32 %v3195_v37, %v3242_v60  ;;  %v709_v18 = vmul.f32 %v3197_v38, %v3242_v60 }
  0xef   : > { %v742_v31 = vadd.f32 %v710_v9, %v573_v25  ;;  %v741_v47 = vadd.f32 %v709_v18, %v572_v26  ;;  %v577_v25 = vmul.f32 %v3145_v15, %v3236_v58  ;;  %v576_v26 = vmul.f32 %v3147_v16, %v3236_v58 }
  0xf0   : > { %v3199_v39 = vpop.permute.xlu1 %630  ;;  %v3201_v40 = vpop.permute.xlu0 %625 }
  0xf1   : > { %v712_v33 = vmul.f32 %v3199_v39, %v3242_v60  ;;  %v711_v48 = vmul.f32 %v3201_v40, %v3242_v60 }
  0xf4   : > { %v3203_v41 = vpop.permute.xlu1 %640  ;;  %v3205_v42 = vpop.permute.xlu0 %635 }
  0xf5   : > { %v713_v18 = vmul.f32 %v3205_v42, %v3242_v60 }
  0xf8   : > { %v3207_v44 = vpop.permute.xlu1 %650  ;;  %v3209_v45 = vpop.permute.xlu0 %645 }
  0xfc   : > { %v3218_v49 = vpop.permute.xlu1 %660  ;;  %v3220_v50 = vpop.permute.xlu0 %655 }
 0x100   : > { %v3228_v55 = vpop.permute.xlu1 %670  ;;  %v3230_v56 = vpop.permute.xlu0 %665 }
 0x101   : > { %4116 = vst [vmem:[#allocation10_spill] sm:$0xff] %v3228_v55  ;;  %4117 = vst [vmem:[#allocation11_spill] sm:$0xff] %v3230_v56 }
 0x104   : > { %v681_v61 = vpop.permute.xlu1 %680  ;;  %v3244_v62 = vpop.permute.xlu0 %675 }
 0x105   : > { %v706_v2 = vmul.f32 %v681_v61, %v3239_v59  ;;  %v722_v3 = vmul.f32 %v681_v61, %v3242_v60  ;;  %v575_v61 = vmul.f32 %v3135_v11, %v3236_v58 }
 0x107   : > { %v3251_v4 = vadd.f32 %v706_v2, %v569_v0  ;;  %v3253_v5 = vadd.f32 %v722_v3, %v585_v1  ;;  %v574_v0 = vmul.f32 %v3125_v7, %v3236_v58  ;;  %v744_v3 = vadd.f32 %v712_v33, %v575_v61 }
 0x108   : > { %v691_v10 = vpop.permute.xlu1 %690  ;;  %v3258_v13 = vpop.permute.xlu0 %685  ;;  %v745_v61 = vadd.f32 %v713_v18, %v576_v26 }
 0x109   : > { %4118 = vst [vmem:[#allocation12_spill] sm:$0xff] %v3251_v4  ;;  %v708_v21 = vmul.f32 %v691_v10, %v3239_v59  ;;  %v724_v22 = vmul.f32 %v691_v10, %v3242_v60 }
 0x10b   : > { %v3274_v29 = vadd.f32 %v708_v21, %v571_v6  ;;  %v3276_v30 = vadd.f32 %v724_v22, %v587_v17  ;;  %v714_v6 = vmul.f32 %v3203_v41, %v3242_v60  ;;  %v743_v17 = vadd.f32 %v711_v48, %v574_v0 }
 0x10c   : > { %v3280_v34 = vpop.permute.xlu1 %789  ;;  %v3282_v35 = vpop.permute.xlu0 %784  ;;  %v716_v48 = vmul.f32 %v3207_v44, %v3242_v60  ;;  %v715_v0 = vmul.f32 %v3209_v45, %v3242_v60 }
 0x10d   : > { %4119 = vst [vmem:[#allocation13_spill] sm:$0xff] %v3274_v29  ;;  %v879_v51 = vmul.f32 %v3280_v34, %v3263_v14  ;;  %v878_v54 = vmul.f32 %v3282_v35, %v3263_v14 }
 0x10f   : > { %v3294_v1 = vadd.f32 %v879_v51, %v742_v31  ;;  %v3296_v2 = vadd.f32 %v878_v54, %v741_v47  ;;  %v746_v47 = vadd.f32 %v714_v6, %v577_v25  ;;  %v579_v6 = vmul.f32 %v3155_v19, %v3236_v58 }
 0x110   : > { %v3300_v9 = vpop.permute.xlu1 %799  ;;  %v3302_v10 = vpop.permute.xlu0 %794  ;;  %v718_v25 = vmul.f32 %v3218_v49, %v3242_v60 }
 0x111   : > { %4120 = vst [vmem:[#allocation14_spill] sm:$0xff] %v3296_v2  ;;  %v881_v21 = vmul.f32 %v3300_v9, %v3263_v14  ;;  %v880_v22 = vmul.f32 %v3302_v10, %v3263_v14  ;;  %v748_v18 = vadd.f32 %v716_v48, %v579_v6  ;;  %v717_v2 = vmul.f32 %v3220_v50, %v3242_v60 }
 0x112   : > { %v580_v48 = vmul.f32 %v3167_v24, %v3236_v58 }
 0x113   : > { %v3314_v31 = vadd.f32 %v881_v21, %v744_v3  ;;  %v3316_v33 = vadd.f32 %v880_v22, %v743_v17  ;;  %v578_v17 = vmul.f32 %v3157_v20, %v3236_v58 }
 0x114   : > { %v3320_v51 = vpop.permute.xlu1 %809  ;;  %v3322_v54 = vpop.permute.xlu0 %804  ;;  %v749_v4 = vadd.f32 %v717_v2, %v580_v48 }
 0x115   : > { %4121 = vst [vmem:[#allocation15_spill] sm:$0xff] %v3316_v33  ;;  %v883_v43 = vmul.f32 %v3320_v51, %v3263_v14  ;;  %v882_v3 = vmul.f32 %v3322_v54, %v3263_v14  ;;  %v747_v33 = vadd.f32 %v715_v0, %v578_v17  ;;  %v720_v0 = vmul.f32 %v3228_v55, %v3242_v60 }
 0x116   : > { %v721_v55 = vmul.f32 %v3244_v62, %v3242_v60 }
 0x117   : > { %v3334_v21 = vadd.f32 %v883_v43, %v746_v47  ;;  %v3336_v22 = vadd.f32 %v882_v3, %v745_v61  ;;  %v581_v47 = vmul.f32 %v3165_v23, %v3236_v58 }
 0x118   : > { %v3340_v26 = vpop.permute.xlu1 %819  ;;  %v3342_v63 = vpop.permute.xlu0 %814 }
 0x119   : > { %4122 = vst [vmem:[#allocation16_spill] sm:$0xff] %v3336_v22  ;;  %4123 = vst [vmem:[#allocation17_spill] sm:$0xff] %v3340_v26  ;;  %v885_v29 = vmul.f32 %v3340_v26, %v3263_v14  ;;  %v884_v43 = vmul.f32 %v3342_v63, %v3263_v14  ;;  %v750_v6 = vadd.f32 %v718_v25, %v581_v47 }
 0x11a   : > { %4124 = vst [vmem:[#allocation18_spill] sm:$0xff] %v3342_v63  ;;  %v719_v26 = vmul.f32 %v3230_v56, %v3242_v60 }
 0x11b   : > { %v917_v61 = vadd.f32 %v885_v29, %v748_v18  ;;  %v3354_v3 = vadd.f32 %v884_v43, %v747_v33  ;;  %v583_v33 = vmul.f32 %v3175_v27, %v3236_v58  ;;  %v582_v18 = vmul.f32 %v3177_v28, %v3236_v58 }
 0x11c   : > { %v3358_v17 = vpop.permute.xlu1 %829  ;;  %v3360_v22 = vpop.permute.xlu0 %824 }
 0x11d   : > { %4125 = vst [vmem:[#allocation19_spill] sm:$0xff] %v3354_v3  ;;  %4126 = vst [vmem:[#allocation20_spill] sm:$0xff] %v3358_v17  ;;  %v887_v63 = vmul.f32 %v3358_v17, %v3263_v14  ;;  %v886_v29 = vmul.f32 %v3360_v22, %v3263_v14  ;;  %v752_v47 = vadd.f32 %v720_v0, %v583_v33 }
 0x11e   : > { %v751_v3 = vadd.f32 %v719_v26, %v582_v18  ;;  %v945_v26 = vsub.s32 3, %v3212_v46  ;;  %v723_v18 = vmul.f32 %v3258_v13, %v3242_v60 }
 0x11f   : > { %v919_v25 = vadd.f32 %v887_v63, %v750_v6  ;;  %v3372_v43 = vadd.f32 %v886_v29, %v749_v4  ;;  %v584_v63 = vmul.f32 %v3185_v32, %v3236_v58 }
 0x120   : > { %v3374_v2 = vpop.permute.xlu1 %839  ;;  %v3376_v48 = vpop.permute.xlu0 %834 }
 0x121   : > { %4127 = vst [vmem:[#allocation21_spill] sm:$0xff] %v3372_v43  ;;  %4128 = vst [vmem:[#allocation22_spill] sm:$0xff] %v3374_v2  ;;  %v889_v17 = vmul.f32 %v3374_v2, %v3263_v14  ;;  %v888_v56 = vmul.f32 %v3376_v48, %v3263_v14  ;;  %v753_v33 = vadd.f32 %v721_v55, %v584_v63 }
 0x123   : > { %v921_v4 = vadd.f32 %v889_v17, %v752_v47  ;;  %v3386_v6 = vadd.f32 %v888_v56, %v751_v3  ;;  %v586_v56 = vmul.f32 %v3193_v36, %v3236_v58 }
 0x124   : > { %v3388_v0 = vpop.permute.xlu1 %849  ;;  %v3390_v29 = vpop.permute.xlu0 %844 }
 0x125   : > { %4129 = vst [vmem:[#allocation23_spill] sm:$0xff] %v3386_v6  ;;  %4130 = vst [vmem:[#allocation24_spill] sm:$0xff] %v3388_v0  ;;  %v891_v43 = vmul.f32 %v3388_v0, %v3263_v14  ;;  %v890_v2 = vmul.f32 %v3390_v29, %v3263_v14  ;;  %v755_v55 = vadd.f32 %v723_v18, %v586_v56 }
 0x126   : > { %v3413_v0 = vrot.slane %v3225_v53, %v945_v26 }
 0x127   : > { %v923_v3 = vadd.f32 %v891_v43, %v3253_v5  ;;  %v3402_v17 = vadd.f32 %v890_v2, %v753_v33 }
 0x128   : > { %v3404_v47 = vpop.permute.xlu1 %859  ;;  %v3406_v6 = vpop.permute.xlu0 %854 }
 0x129   : > { %4131 = vst [vmem:[#allocation25_spill] sm:$0xff] %v3402_v17  ;;  %4132 = vst [vmem:[#allocation26_spill] sm:$0xff] %v3404_v47  ;;  %v893_v60 = vmul.f32 %v3404_v47, %v3263_v14  ;;  %v892_v63 = vmul.f32 %v3406_v6, %v3263_v14 }
 0x12a   : > { %4133 = vst [vmem:[#allocation27_spill] sm:$0xff] %v3406_v6  ;;  %v556_v6 = vmul.f32 %v3127_v8, %v3233_v57 }
 0x12b   : > { %v925_v58 = vadd.f32 %v893_v60, %v3276_v30  ;;  %v3416_v36 = vadd.f32 %v892_v63, %v755_v55 }
 0x12c   : > { %v959_v5 = vpop.permute.xlu1 %958  ;;  %v3418_v43 = vpop.permute.xlu0 %953 }
 0x12d   : > { %4134 = vst [vmem:[#allocation28_spill] sm:$0xff] %v3416_v36  ;;  %v1048_v2 = vmul.f32 %v959_v5, %v3413_v0 }
 0x12f   : > { %v3422_v33 = vadd.f32 %v1048_v2, %v3294_v1 }
 0x130   : > { %v3424_v18 = vpop.permute.xlu1 %968  ;;  %v3426_v56 = vpop.permute.xlu0 %963 }
 0x131   : > { %4135 = vst [vmem:[#allocation29_spill] sm:$0xff] %v3422_v33  ;;  %v1050_v53 = vmul.f32 %v3424_v18, %v3413_v0 }
 0x133   : > { %v3431_v14 = vadd.f32 %v1050_v53, %v3314_v31 }
 0x134   : > { %v3433_v30 = vpop.permute.xlu1 %978  ;;  %v3435_v55 = vpop.permute.xlu0 %973 }
 0x135   : > { %4136 = vst [vmem:[#allocation30_spill] sm:$0xff] %v3431_v14  ;;  %v1052_v60 = vmul.f32 %v3433_v30, %v3413_v0 }
 0x137   : > { %v3440_v1 = vadd.f32 %v1052_v60, %v3334_v21 }
 0x138   : > { %v3442_v63 = vpop.permute.xlu1 %988  ;;  %v3444_v2 = vpop.permute.xlu0 %983 }
 0x139   : > { %4137 = vst [vmem:[#allocation31_spill] sm:$0xff] %v3440_v1  ;;  %v1054_v36 = vmul.f32 %v3442_v63, %v3413_v0  ;;  %v4140_v1 = vsub.s32 2, %v3212_v46  ;;  %v693_v46 = vmul.f32 %v3197_v38, %v3239_v59  ;;  %v561_v38 = vmul.f32 %v3145_v15, %v3233_v57 }
 0x13a   : > { %v695_v15 = vmul.f32 %v3201_v40, %v3239_v59  ;;  %v564_v40 = vmul.f32 %v3167_v24, %v3233_v57 }
 0x13b   : > { %v3448_v17 = vadd.f32 %v1054_v36, %v917_v61  ;;  %v3465_v47 = vrot.slane %v3223_v52, %v4140_v1  ;;  %v694_v61 = vmul.f32 %v3195_v37, %v3239_v59  ;;  %v557_v37 = vmul.f32 %v3137_v12, %v3233_v57 }
 0x13c   : > { %v3450_v31 = vpop.permute.xlu1 %998  ;;  %v3452_v53 = vpop.permute.xlu0 %993  ;;  %v3502_v12 = vmul.f32 %v3155_v19, %v3233_v57  ;;  %v565_v19 = vmul.f32 %v3165_v23, %v3233_v57  ;;  %v3531_v23 = vmul.f32 %v3175_v27, %v3233_v57  ;;  %v3545_v27 = vmul.f32 %v3177_v28, %v3233_v57 }
 0x13d   : > { %4138 = vst [vmem:[#allocation32_spill] sm:$0xff] %v3448_v17  ;;  %v1056_v14 = vmul.f32 %v3450_v31, %v3413_v0  ;;  %v3472_v17 = vrot.slane %v3223_v52, %v945_v26  ;;  %v863_v52 = vmul.f32 %v3280_v34, %v3465_v47  ;;  %v560_v26 = vmul.f32 %v3147_v16, %v3233_v57 }
 0x13e   : > { %v862_v8 = vmul.f32 %v3282_v35, %v3465_v47  ;;  %v726_v34 = vadd.f32 %v694_v61, %v557_v37  ;;  %v864_v61 = vmul.f32 %v3302_v10, %v3465_v47  ;;  %v865_v24 = vmul.f32 %v3300_v9, %v3465_v47 }
 0x13f   : > { %v3456_v33 = vadd.f32 %v1056_v14, %v919_v25  ;;  %v558_v14 = vmul.f32 %v3125_v7, %v3233_v57  ;;  %v559_v7 = vmul.f32 %v3135_v11, %v3233_v57  ;;  %v562_v11 = vmul.f32 %v3157_v20, %v3233_v57 }
 0x140   : > { %v3458_v21 = vpop.permute.xlu1 %1008  ;;  %v3460_v60 = vpop.permute.xlu0 %1003  ;;  %v1031_v16 = vmul.f32 %v3418_v43, %v3472_v17  ;;  %v699_v28 = vmul.f32 %v3209_v45, %v3239_v59  ;;  %v701_v45 = vmul.f32 %v3220_v50, %v3239_v59  ;;  %v4145_v50 = vld [vmem:[#allocation17_spill] sm:$0xff] }
 0x141   : > { %4139 = vst [vmem:[#allocation33_spill] sm:$0xff] %v3456_v33  ;;  %v1058_v36 = vmul.f32 %v3458_v21, %v3413_v0 }
 0x143   : > { %v3474_v25 = vadd.f32 %v1058_v36, %v921_v4  ;;  %v1032_v36 = vmul.f32 %v959_v5, %v3472_v17  ;;  %v895_v5 = vadd.f32 %v863_v52, %v726_v34 }
 0x144   : > { %v3480_v33 = vpop.permute.xlu1 %1018  ;;  %v3482_v1 = vpop.permute.xlu0 %1013 }
 0x145   : > { %4141 = vst [vmem:[#allocation34_spill] sm:$0xff] %v3474_v25  ;;  %4142 = vst [vmem:[#allocation35_spill] sm:$0xff] %v3480_v33  ;;  %v1060_v4 = vmul.f32 %v3480_v33, %v3413_v0  ;;  %v725_v33 = vadd.f32 %v693_v46, %v556_v6  ;;  %v698_v46 = vmul.f32 %v3203_v41, %v3239_v59 }
 0x146   : > { %4143 = vst [vmem:[#allocation36_spill] sm:$0xff] %v3482_v1  ;;  %v1064_v37 = vadd.f32 %v1032_v36, %v895_v5  ;;  %v1033_v41 = vmul.f32 %v3426_v56, %v3472_v17  ;;  %v1034_v36 = vmul.f32 %v3424_v18, %v3472_v17  ;;  %v1035_v5 = vmul.f32 %v3435_v55, %v3472_v17 }
 0x147   : > { %v3505_v25 = vadd.f32 %v1060_v4, %v923_v3  ;;  %v696_v3 = vmul.f32 %v3199_v39, %v3239_v59  ;;  %v894_v6 = vadd.f32 %v862_v8, %v725_v33  ;;  %v697_v39 = vmul.f32 %v3205_v42, %v3239_v59 }
 0x148   : > { %v3513_v35 = vpop.permute.xlu1 %1028  ;;  %v3515_v1 = vpop.permute.xlu0 %1023  ;;  %v727_v4 = vadd.f32 %v695_v15, %v558_v14  ;;  %v866_v42 = vmul.f32 %v3322_v54, %v3465_v47  ;;  %v730_v34 = vadd.f32 %v698_v46, %v561_v38  ;;  %v700_v18 = vmul.f32 %v3207_v44, %v3239_v59 }
 0x149   : > { %v1062_v20 = vmul.f32 %v3513_v35, %v3413_v0  ;;  %v1063_v10 = vadd.f32 %v1031_v16, %v894_v6  ;;  %v728_v8 = vadd.f32 %v696_v3, %v559_v7  ;;  %v729_v16 = vadd.f32 %v697_v39, %v560_v26 }
 0x14a   : > { %v896_v9 = vadd.f32 %v864_v61, %v727_v4  ;;  %v867_v7 = vmul.f32 %v3320_v51, %v3465_v47  ;;  %v702_v26 = vmul.f32 %v3218_v49, %v3239_v59  ;;  %v4144_v61 = vld [vmem:[#allocation18_spill] sm:$0xff]  ;;  %v568_v44 = vmul.f32 %v3185_v32, %v3233_v57 }
 0x14b   : > { %v3535_v52 = vadd.f32 %v1062_v20, %v925_v58  ;;  %v897_v54 = vadd.f32 %v865_v24, %v728_v8  ;;  %v898_v6 = vadd.f32 %v866_v42, %v729_v16  ;;  %v868_v39 = vmul.f32 %v4144_v61, %v3465_v47 }
 0x14c   : > { %v3541_v33 = vpop.permute.xlu1 %1118  ;;  %v3550_v14 = vpop.permute.xlu0 %1113  ;;  %v1065_v38 = vadd.f32 %v1033_v41, %v896_v9  ;;  %v731_v49 = vadd.f32 %v699_v28, %v562_v11  ;;  %v899_v41 = vadd.f32 %v867_v7, %v730_v34  ;;  %v1037_v8 = vmul.f32 %v3444_v2, %v3472_v17 }
 0x14d   : > { %v1192_v58 = vadd.f32 %v3541_v33, %v1064_v37  ;;  %v1191_v15 = vadd.f32 %v3550_v14, %v1063_v10  ;;  %v1036_v37 = vmul.f32 %v3433_v30, %v3472_v17  ;;  %v1066_v4 = vadd.f32 %v1034_v36, %v897_v54  ;;  %v4146_v54 = vld [vmem:[#allocation11_spill] sm:$0xff] }
 0x14e   : > { %v869_v10 = vmul.f32 %v4145_v50, %v3465_v47  ;;  %v1067_v30 = vadd.f32 %v1035_v5, %v898_v6  ;;  %v732_v36 = vadd.f32 %v700_v18, %v3502_v12  ;;  %v733_v16 = vadd.f32 %v701_v45, %v564_v40  ;;  %v4147_v12 = vld [vmem:[#allocation20_spill] sm:$0xff]  ;;  %v4148_v45 = vld [vmem:[#allocation10_spill] sm:$0xff] }
 0x14f   : > { %v1224_v3 = vmax.f32 %v1192_v58, 0.0  ;;  %v1223_v46 = vmax.f32 %v1191_v15, 0.0  ;;  %v734_v15 = vadd.f32 %v702_v26, %v565_v19  ;;  %v870_v32 = vmul.f32 %v3360_v22, %v3465_v47 }
 0x150   : > { %v3561_v20 = vpop.permute.xlu1 %1128  ;;  %v3569_v51 = vpop.permute.xlu0 %1123  ;;  %v900_v34 = vadd.f32 %v868_v39, %v731_v49  ;;  %v1038_v28 = vmul.f32 %v3442_v63, %v3472_v17  ;;  %v1068_v7 = vadd.f32 %v1036_v37, %v899_v41  ;;  %v703_v5 = vmul.f32 %v4146_v54, %v3239_v59 }
 0x151   : > { %1289 = vadd.xlane.f32.xlu1 %v1224_v3  ;;  %v1193_v24 = vadd.f32 %v3569_v51, %v1065_v38  ;;  %1287 = vadd.xlane.f32.xlu0 %v1223_v46  ;;  %v1194_v42 = vadd.f32 %v3561_v20, %v1066_v4  ;;  %v901_v38 = vadd.f32 %v869_v10, %v732_v36 }
 0x152   : > { %v871_v19 = vmul.f32 %v4147_v12, %v3465_v47  ;;  %v1039_v22 = vmul.f32 %v3452_v53, %v3472_v17  ;;  %v1069_v18 = vadd.f32 %v1037_v8, %v900_v34  ;;  %v704_v6 = vmul.f32 %v4148_v45, %v3239_v59  ;;  %v4149_v8 = vld [vmem:[#allocation22_spill] sm:$0xff] }
 0x153   : > { %v1225_v9 = vmax.f32 %v1193_v24, 0.0  ;;  %v1226_v26 = vmax.f32 %v1194_v42, 0.0  ;;  %v705_v61 = vmul.f32 %v3244_v62, %v3239_v59  ;;  %v902_v39 = vadd.f32 %v870_v32, %v733_v16 }
 0x154   : > { %v3583_v58 = vpop.permute.xlu1 %1138  ;;  %v3588_v11 = vpop.permute.xlu0 %1133  ;;  %v872_v37 = vmul.f32 %v3376_v48, %v3465_v47  ;;  %v1040_v24 = vmul.f32 %v3450_v31, %v3472_v17  ;;  %v1070_v49 = vadd.f32 %v1038_v28, %v901_v38  ;;  %v735_v50 = vadd.f32 %v703_v5, %v3545_v27  ;;  %v4151_v38 = vld [vmem:[#allocation36_spill] sm:$0xff] }
 0x155   : > { %v1195_v3 = vadd.f32 %v3588_v11, %v1067_v30  ;;  %1291 = vadd.xlane.f32.xlu0 %v1225_v9  ;;  %v1196_v40 = vadd.f32 %v3583_v58, %v1068_v7  ;;  %v903_v10 = vadd.f32 %v871_v19, %v734_v15  ;;  %v873_v62 = vmul.f32 %v4149_v8, %v3465_v47 }
 0x156   : > { %v1071_v42 = vadd.f32 %v1039_v22, %v902_v39  ;;  %v1041_v48 = vmul.f32 %v3460_v60, %v3472_v17  ;;  %v736_v16 = vadd.f32 %v704_v6, %v3531_v23  ;;  %v737_v32 = vadd.f32 %v705_v61, %v568_v44  ;;  %v4150_v23 = vld [vmem:[#allocation24_spill] sm:$0xff]  ;;  %v4154_v6 = vld [vmem:[#allocation35_spill] sm:$0xff] }
 0x157   : > { %v1227_v63 = vmax.f32 %v1195_v3, 0.0  ;;  %v1228_v36 = vmax.f32 %v1196_v40, 0.0  ;;  %v904_v34 = vadd.f32 %v872_v37, %v735_v50  ;;  %v874_v27 = vmul.f32 %v3390_v29, %v3465_v47  ;;  %v4156_v50 = vld [vmem:[#allocation26_spill] sm:$0xff] }
 0x158   : > { %v3600_v46 = vpop.permute.xlu1 %1148  ;;  %v3608_v4 = vpop.permute.xlu0 %1143  ;;  %v1042_v28 = vmul.f32 %v3458_v21, %v3472_v17  ;;  %v1072_v7 = vadd.f32 %v1040_v24, %v903_v10  ;;  %v707_v54 = vmul.f32 %v3258_v13, %v3239_v59  ;;  %v905_v5 = vadd.f32 %v873_v62, %v736_v16  ;;  %v4153_v59 = vld [vmem:[#allocation27_spill] sm:$0xff] }
 0x159   : > { %v1197_v41 = vadd.f32 %v3608_v4, %v1069_v18  ;;  %1295 = vadd.xlane.f32.xlu1 %v1227_v63  ;;  %1293 = vadd.xlane.f32.xlu0 %v1226_v26  ;;  %v1198_v30 = vadd.f32 %v3600_v46, %v1070_v49  ;;  %v875_v44 = vmul.f32 %v4150_v23, %v3465_v47  ;;  %v4152_v18 = vld [vmem:[#allocation8_spill] sm:$0xff]  ;;  %v4158_v23 = vld [vmem:[#allocation14_spill] sm:$0xff] }
 0x15a   : > { %v1043_v29 = vmul.f32 %v4151_v38, %v3472_v17  ;;  %v1073_v21 = vadd.f32 %v1041_v48, %v904_v34  ;;  %v570_v63 = vmul.f32 %v4152_v18, %v3233_v57  ;;  %v906_v26 = vadd.f32 %v874_v27, %v737_v32  ;;  %v4155_v49 = vld [vmem:[#allocation12_spill] sm:$0xff]  ;;  %v4157_v27 = vld [vmem:[#allocation13_spill] sm:$0xff] }
 0x15b   : > { %v1229_v31 = vmax.f32 %v1197_v41, 0.0  ;;  %v1230_v40 = vmax.f32 %v1198_v30, 0.0  ;;  %v876_v13 = vmul.f32 %v4153_v59, %v3465_v47  ;;  %v1044_v61 = vmul.f32 %v4154_v6, %v3472_v17 }
 0x15c   : > { %v3619_v9 = vpop.permute.xlu1 %1158  ;;  %v3624_v15 = vpop.permute.xlu0 %1153  ;;  %v1074_v39 = vadd.f32 %v1042_v28, %v905_v5  ;;  %v739_v24 = vadd.f32 %v707_v54, %v570_v63  ;;  %v907_v41 = vadd.f32 %v875_v44, %v4155_v49  ;;  %v877_v57 = vmul.f32 %v4156_v50, %v3465_v47 }
 0x15d   : > { %v1199_v3 = vadd.f32 %v3624_v15, %v1071_v42  ;;  %1299 = vadd.xlane.f32.xlu1 %v1229_v31  ;;  %1297 = vadd.xlane.f32.xlu0 %v1228_v36  ;;  %v1200_v12 = vadd.f32 %v3619_v9, %v1072_v7  ;;  %v1075_v10 = vadd.f32 %v1043_v29, %v906_v26  ;;  %v4159_v26 = vld [vmem:[#allocation15_spill] sm:$0xff] }
 0x15e   : > { %v1045_v8 = vmul.f32 %v3515_v1, %v3472_v17  ;;  %v908_v31 = vadd.f32 %v876_v13, %v739_v24  ;;  %v1047_v36 = vmul.f32 %v3418_v43, %v3413_v0  ;;  %v1046_v32 = vmul.f32 %v3513_v35, %v3472_v17  ;;  %v4160_v13 = vld [vmem:[#allocation29_spill] sm:$0xff] }
 0x15f   : > { %v1231_v22 = vmax.f32 %v1199_v3, 0.0  ;;  %v1232_v30 = vmax.f32 %v1200_v12, 0.0  ;;  %v1076_v47 = vadd.f32 %v1044_v61, %v907_v41  ;;  %v909_v28 = vadd.f32 %v877_v57, %v4157_v27  ;;  %v4167_v27 = vld [vmem:[#allocation23_spill] sm:$0xff] }
 0x160   : > { %v3636_v19 = vpop.permute.xlu1 %1168  ;;  %v3642_v45 = vpop.permute.xlu0 %1163  ;;  %v1077_v3 = vadd.f32 %v1045_v8, %v908_v31  ;;  %v1079_v44 = vadd.f32 %v1047_v36, %v4158_v23  ;;  %v1049_v17 = vmul.f32 %v3426_v56, %v3413_v0  ;;  %v1051_v63 = vmul.f32 %v3435_v55, %v3413_v0  ;;  %v4162_v55 = vld [vmem:[#allocation30_spill] sm:$0xff]  ;;  %v4165_v31 = vld [vmem:[#allocation21_spill] sm:$0xff] }
 0x161   : > { %v1201_v37 = vadd.f32 %v3642_v45, %v1073_v21  ;;  %1303 = vadd.xlane.f32.xlu1 %v1231_v22  ;;  %1301 = vadd.xlane.f32.xlu0 %v1230_v40  ;;  %v1202_v62 = vadd.f32 %v3636_v19, %v1074_v39  ;;  %v1078_v35 = vadd.f32 %v1046_v32, %v909_v28 }
 0x162   : > { %v1207_v21 = vadd.f32 %v3550_v14, %v1079_v44  ;;  %v1081_v59 = vadd.f32 %v1049_v17, %v4159_v26  ;;  %v1208_v56 = vadd.f32 %v3541_v33, %v4160_v13  ;;  %v1053_v14 = vmul.f32 %v3444_v2, %v3413_v0  ;;  %v4164_v2 = vld [vmem:[#allocation31_spill] sm:$0xff] }
 0x163   : > { %v1233_v48 = vmax.f32 %v1201_v37, 0.0  ;;  %v1234_v5 = vmax.f32 %v1202_v62, 0.0  ;;  %v4161_v37 = vld [vmem:[#allocation16_spill] sm:$0xff]  ;;  %v1210_v41 = vadd.f32 %v3561_v20, %v4162_v55  ;;  %v1055_v33 = vmul.f32 %v3452_v53, %v3413_v0 }
 0x164   : > { %v3653_v42 = vpop.permute.xlu1 %1178  ;;  %v3657_v16 = vpop.permute.xlu0 %1173  ;;  %v1209_v6 = vadd.f32 %v3569_v51, %v1081_v59  ;;  %v1239_v61 = vmax.f32 %v1207_v21, 0.0  ;;  %v1083_v24 = vadd.f32 %v1051_v63, %v4161_v37  ;;  %v1240_v49 = vmax.f32 %v1208_v56, 0.0  ;;  %v4163_v51 = vld [vmem:[#allocation19_spill] sm:$0xff]  ;;  %v4166_v53 = vld [vmem:[#allocation32_spill] sm:$0xff]  ;;  %v1258_v56 = vld [vmem:[#allocation2 + $0x18] sm:$0xff] }
 0x165   : > { %v1203_v34 = vadd.f32 %v3657_v16, %v1075_v10  ;;  %1307 = vadd.xlane.f32.xlu1 %v1233_v48  ;;  %1305 = vadd.xlane.f32.xlu0 %v1232_v30  ;;  %v1204_v7 = vadd.f32 %v3653_v42, %v1076_v47  ;;  %v1085_v10 = vadd.f32 %v1053_v14, %v4163_v51  ;;  %v1242_v8 = vmax.f32 %v1210_v41, 0.0  ;;  %v1255_v63 = vld [vmem:[#allocation2] sm:$0xff]  ;;  %v1261_v37 = vld [vmem:[#allocation2 + $0x30] sm:$0xff] }
 0x166   : > { %v1211_v50 = vadd.f32 %v3588_v11, %v1083_v24  ;;  %v1241_v57 = vmax.f32 %v1209_v6, 0.0  ;;  %v1212_v62 = vadd.f32 %v3583_v58, %v4164_v2  ;;  %v1057_v20 = vmul.f32 %v3460_v60, %v3413_v0  ;;  %v4168_v60 = vld [vmem:[#allocation33_spill] sm:$0xff]  ;;  %v1260_v24 = vld [vmem:[#allocation2 + $0x28] sm:$0xff] }
 0x167   : > { %v1235_v54 = vmax.f32 %v1203_v34, 0.0  ;;  %v1236_v18 = vmax.f32 %v1204_v7, 0.0  ;;  %v1213_v30 = vadd.f32 %v3608_v4, %v1085_v10  ;;  %v1087_v11 = vadd.f32 %v1055_v33, %v4165_v31  ;;  %v1262_v33 = vld [vmem:[#allocation2 + $0x38] sm:$0xff] }
 0x168   : > { %v3665_v43 = vpop.permute.xlu1 %1188  ;;  %v3667_v29 = vpop.permute.xlu0 %1183  ;;  %v1243_v48 = vmax.f32 %v1211_v50, 0.0  ;;  %v1244_v36 = vmax.f32 %v1212_v62, 0.0  ;;  %v1214_v32 = vadd.f32 %v3600_v46, %v4166_v53  ;;  %v1059_v58 = vmul.f32 %v4151_v38, %v3413_v0  ;;  %v4170_v38 = vld [vmem:[#allocation34_spill] sm:$0xff]  ;;  %v1265_v62 = vld [vmem:[#allocation2 + $0x50] sm:$0xff] }
 0x169   : > { %v1205_v12 = vadd.f32 %v3667_v29, %v1077_v3  ;;  %1311 = vadd.xlane.f32.xlu1 %v1235_v54  ;;  %1309 = vadd.xlane.f32.xlu0 %v1234_v5  ;;  %v1206_v22 = vadd.f32 %v3665_v43, %v1078_v35  ;;  %v1245_v47 = vmax.f32 %v1213_v30, 0.0  ;;  %v1215_v34 = vadd.f32 %v3624_v15, %v1087_v11  ;;  %v4169_v5 = vld [vmem:[#allocation25_spill] sm:$0xff] }
 0x16a   : > { %v1089_v28 = vadd.f32 %v1057_v20, %v4167_v27  ;;  %v1246_v4 = vmax.f32 %v1214_v32, 0.0  ;;  %v1216_v7 = vadd.f32 %v3619_v9, %v4168_v60  ;;  %v1061_v46 = vmul.f32 %v3515_v1, %v3413_v0  ;;  %v1266_v53 = vld [vmem:[#allocation2 + $0x58] sm:$0xff]  ;;  %v1269_v27 = vld [vmem:[#allocation2 + $0x70] sm:$0xff] }
 0x16b   : > { %v1237_v40 = vmax.f32 %v1205_v12, 0.0  ;;  %v1238_v39 = vmax.f32 %v1206_v22, 0.0  ;;  %v1247_v3 = vmax.f32 %v1215_v34, 0.0  ;;  %v1091_v23 = vadd.f32 %v1059_v58, %v4169_v5  ;;  %v4171_v12 = vld [vmem:[#allocation28_spill] sm:$0xff] }
 0x16c   : > { %v1217_v54 = vadd.f32 %v3642_v45, %v1089_v28  ;;  %v1248_v15 = vmax.f32 %v1216_v7, 0.0  ;;  %v1218_v44 = vadd.f32 %v3636_v19, %v4170_v38  ;;  %v1093_v21 = vadd.f32 %v1061_v46, %v4171_v12  ;;  %v1268_v28 = vld [vmem:[#allocation2 + $0x68] sm:$0xff]  ;;  %v1270_v46 = vld [vmem:[#allocation2 + $0x78] sm:$0xff] }
 0x16d   : > { %1315 = vadd.xlane.f32.xlu1 %v1237_v40  ;;  %1313 = vadd.xlane.f32.xlu0 %v1236_v18  ;;  %v1219_v35 = vadd.f32 %v3657_v16, %v1091_v23  ;;  %v1220_v0 = vadd.f32 %v3653_v42, %v3505_v25  ;;  %v1222_v19 = vadd.f32 %v3665_v43, %v3535_v52  ;;  %v1256_v18 = vld [vmem:[#allocation2 + $0x8] sm:$0xff]  ;;  %v1259_v43 = vld [vmem:[#allocation2 + $0x20] sm:$0xff] }
 0x16e   : > { %v1249_v17 = vmax.f32 %v1217_v54, 0.0  ;;  %v1250_v9 = vmax.f32 %v1218_v44, 0.0  ;;  %v1221_v45 = vadd.f32 %v3667_v29, %v1093_v21  ;;  %v1257_v29 = vld [vmem:[#allocation2 + $0x10] sm:$0xff]  ;;  %v1271_v54 = vld [vmem:[#allocation2 + $0x80] sm:$0xff] }
 0x16f   : > { %v1251_v1 = vmax.f32 %v1219_v35, 0.0  ;;  %v1252_v22 = vmax.f32 %v1220_v0, 0.0  ;;  %v1254_v16 = vmax.f32 %v1222_v19, 0.0  ;;  %v1273_v44 = vld [vmem:[#allocation2 + $0x90] sm:$0xff]  ;;  %v1275_v0 = vld [vmem:[#allocation2 + $0xa0] sm:$0xff] }
 0x170   : > { %v1253_v40 = vmax.f32 %v1221_v45, 0.0 }
 0x171   : > { %1319 = vadd.xlane.f32.xlu1 %v1239_v61  ;;  %1317 = vadd.xlane.f32.xlu0 %v1238_v39 }
 0x175   : > { %1323 = vadd.xlane.f32.xlu1 %v1241_v57  ;;  %1321 = vadd.xlane.f32.xlu0 %v1240_v49  ;;  %v1263_v57 = vld [vmem:[#allocation2 + $0x40] sm:$0xff] }
 0x179   : > { %1327 = vadd.xlane.f32.xlu1 %v1243_v48  ;;  %1325 = vadd.xlane.f32.xlu0 %v1242_v8  ;;  %v1264_v48 = vld [vmem:[#allocation2 + $0x48] sm:$0xff] }
 0x17d   : > { %1331 = vadd.xlane.f32.xlu1 %v1245_v47  ;;  %1329 = vadd.xlane.f32.xlu0 %v1244_v36  ;;  %v1267_v36 = vld [vmem:[#allocation2 + $0x60] sm:$0xff] }
 0x181   : > { %1335 = vadd.xlane.f32.xlu1 %v1247_v3  ;;  %1333 = vadd.xlane.f32.xlu0 %v1246_v4 }
 0x185   : > { %1339 = vadd.xlane.f32.xlu1 %v1249_v17  ;;  %1337 = vadd.xlane.f32.xlu0 %v1248_v15  ;;  %v1272_v17 = vld [vmem:[#allocation2 + $0x88] sm:$0xff] }
 0x189   : > { %1343 = vadd.xlane.f32.xlu1 %v1251_v1  ;;  %1341 = vadd.xlane.f32.xlu0 %v1250_v9  ;;  %v1274_v1 = vld [vmem:[#allocation2 + $0x98] sm:$0xff] }
 0x18d   : > { %1347 = vadd.xlane.f32.xlu1 %v1253_v40  ;;  %1345 = vadd.xlane.f32.xlu0 %v1252_v22 }
 0x191   : > { %1349 = vadd.xlane.f32.xlu0 %v1254_v16  ;;  %v1277_v16 = vld [vmem:[#allocation2 + $0xb0] sm:$0xff] }
 0x1de   : > { %v1290_v26 = vpop.xlane.xlu1 %1289  ;;  %v1288_v42 = vpop.xlane.xlu0 %1287 }
 0x1df   : > { %v1352_v25 = vadd.f32 %v1290_v26, %v1256_v18  ;;  %v1351_v59 = vadd.f32 %v1288_v42, %v1255_v63  ;;  %v1276_v18 = vld [vmem:[#allocation2 + $0xa8] sm:$0xff] }
 0x1e1   : > { %1385 = vst.msk [vmem:[#allocation2 + $0x8] sm:$0xff] %vm1383_vm2, %v1352_v25  ;;  %1384 = vst.msk [vmem:[#allocation2] sm:$0xff] %vm1383_vm2, %v1351_v59  ;;  %v1279_v59 = vld [vmem:[#allocation2 + $0xc0] sm:$0xff] }
 0x1e2   : > { %v1292_v13 = vpop.xlane.xlu0 %1291 }
 0x1e3   : > { %v1353_v52 = vadd.f32 %v1292_v13, %v1257_v29  ;;  %v1278_v29 = vld [vmem:[#allocation2 + $0xb8] sm:$0xff] }
 0x1e5   : > { %1386 = vst.msk [vmem:[#allocation2 + $0x10] sm:$0xff] %vm1383_vm2, %v1353_v52 }
 0x1e6   : > { %v1296_v6 = vpop.xlane.xlu1 %1295  ;;  %v1294_v61 = vpop.xlane.xlu0 %1293 }
 0x1e7   : > { %v1355_v39 = vadd.f32 %v1296_v6, %v1259_v43  ;;  %v1354_v14 = vadd.f32 %v1294_v61, %v1258_v56  ;;  %v1281_v6 = vld [vmem:[#allocation2 + $0xd0] sm:$0xff]  ;;  %v1280_v61 = vld [vmem:[#allocation2 + $0xc8] sm:$0xff] }
 0x1e9   : > { %1388 = vst.msk [vmem:[#allocation2 + $0x20] sm:$0xff] %vm1383_vm2, %v1355_v39  ;;  %1387 = vst.msk [vmem:[#allocation2 + $0x18] sm:$0xff] %vm1383_vm2, %v1354_v14 }
 0x1ea   : > { %v1300_v49 = vpop.xlane.xlu1 %1299  ;;  %v1298_v55 = vpop.xlane.xlu0 %1297 }
 0x1eb   : > { %v1357_v41 = vadd.f32 %v1300_v49, %v1261_v37  ;;  %v1356_v50 = vadd.f32 %v1298_v55, %v1260_v24  ;;  %v1283_v49 = vld [vmem:[#allocation2 + $0xe0] sm:$0xff]  ;;  %v1282_v55 = vld [vmem:[#allocation2 + $0xd8] sm:$0xff] }
 0x1ed   : > { %1390 = vst.msk [vmem:[#allocation2 + $0x30] sm:$0xff] %vm1383_vm2, %v1357_v41  ;;  %1389 = vst.msk [vmem:[#allocation2 + $0x28] sm:$0xff] %vm1383_vm2, %v1356_v50 }
 0x1ee   : > { %v1304_v51 = vpop.xlane.xlu1 %1303  ;;  %v1302_v10 = vpop.xlane.xlu0 %1301 }
 0x1ef   : > { %v1359_v8 = vadd.f32 %v1304_v51, %v1263_v57  ;;  %v1358_v2 = vadd.f32 %v1302_v10, %v1262_v33  ;;  %v1285_v51 = vld [vmem:[#allocation2 + $0xf0] sm:$0xff]  ;;  %v1284_v10 = vld [vmem:[#allocation2 + $0xe8] sm:$0xff] }
 0x1f1   : > { %1392 = vst.msk [vmem:[#allocation2 + $0x40] sm:$0xff] %vm1383_vm2, %v1359_v8  ;;  %1391 = vst.msk [vmem:[#allocation2 + $0x38] sm:$0xff] %vm1383_vm2, %v1358_v2 }
 0x1f2   : > { %v1308_v30 = vpop.xlane.xlu1 %1307  ;;  %v1306_v20 = vpop.xlane.xlu0 %1305 }
 0x1f3   : > { %v1361_v31 = vadd.f32 %v1308_v30, %v1265_v62  ;;  %v1360_v11 = vadd.f32 %v1306_v20, %v1264_v48  ;;  %v1286_v30 = vld [vmem:[#allocation2 + $0xf8] sm:$0xff] }
 0x1f5   : > { %1394 = vst.msk [vmem:[#allocation2 + $0x50] sm:$0xff] %vm1383_vm2, %v1361_v31  ;;  %1393 = vst.msk [vmem:[#allocation2 + $0x48] sm:$0xff] %vm1383_vm2, %v1360_v11  ;;  %v1420_v11 = vld [vmem:[#allocation2] sm:$0xff] (!%p2432_p1) }
 0x1f6   : > { %v1312_v32 = vpop.xlane.xlu1 %1311  ;;  %v1310_v47 = vpop.xlane.xlu0 %1309 }
 0x1f7   : > { %v1363_v34 = vadd.f32 %v1312_v32, %v1267_v36  ;;  %v1362_v58 = vadd.f32 %v1310_v47, %v1266_v53  ;;  %v1484_v36 = vld [vmem:[#allocation3] sm:$0xff] (!%p2432_p1)  ;;  %v1421_v53 = vld [vmem:[#allocation2 + $0x8] sm:$0xff] (!%p2432_p1)  ;;  %v1452_v32 = vmul.f32 (!%p2432_p1), 0.00390625, %v1420_v11 }
 0x1f8   : > { %v1453_v47 = vmul.f32 (!%p2432_p1), 0.00390625, %v1421_v53  ;;  %v1500_v11 = vld [vmem:[#allocation3 + $0x80] sm:$0xff] (!%p2432_p1)  ;;  %v1501_v53 = vld [vmem:[#allocation3 + $0x88] sm:$0xff] (!%p2432_p1) }
 0x1f9   : > { %1396 = vst.msk [vmem:[#allocation2 + $0x60] sm:$0xff] %vm1383_vm2, %v1363_v34  ;;  %1395 = vst.msk [vmem:[#allocation2 + $0x58] sm:$0xff] %vm1383_vm2, %v1362_v58  ;;  %v1485_v34 = vld [vmem:[#allocation3 + $0x8] sm:$0xff] (!%p2432_p1)  ;;  %v1422_v58 = vld [vmem:[#allocation2 + $0x10] sm:$0xff] (!%p2432_p1) }
 0x1fa   : > { %v1316_v4 = vpop.xlane.xlu1 %1315  ;;  %v1314_v60 = vpop.xlane.xlu0 %1313 }
 0x1fb   : > { %v1365_v7 = vadd.f32 %v1316_v4, %v1269_v27  ;;  %v1364_v3 = vadd.f32 %v1314_v60, %v1268_v28  ;;  %v1486_v27 = vld [vmem:[#allocation3 + $0x10] sm:$0xff] (!%p2432_p1)  ;;  %v1454_v28 = vmul.f32 (!%p2432_p1), 0.00390625, %v1422_v58  ;;  %v1423_v4 = vld [vmem:[#allocation2 + $0x18] sm:$0xff] (!%p2432_p1) }
 0x1fc   : > { %v1487_v60 = vld [vmem:[#allocation3 + $0x18] sm:$0xff] (!%p2432_p1)  ;;  %v1502_v58 = vld [vmem:[#allocation3 + $0x90] sm:$0xff] (!%p2432_p1) }
 0x1fd   : > { %1398 = vst.msk [vmem:[#allocation2 + $0x70] sm:$0xff] %vm1383_vm2, %v1365_v7  ;;  %1397 = vst.msk [vmem:[#allocation2 + $0x68] sm:$0xff] %vm1383_vm2, %v1364_v3  ;;  %v1424_v7 = vld [vmem:[#allocation2 + $0x20] sm:$0xff] (!%p2432_p1)  ;;  %v1516_v3 = vmax.f32 (!%p2432_p1), %v1484_v36, %v1452_v32 }
 0x1fe   : > { %v1320_v5 = vpop.xlane.xlu1 %1319  ;;  %v1318_v23 = vpop.xlane.xlu0 %1317 }
 0x1ff   : > { %v1367_v15 = vadd.f32 %v1320_v5, %v1271_v54  ;;  %v1366_v38 = vadd.f32 %v1318_v23, %v1270_v46  ;;  %v1517_v54 = vmax.f32 (!%p2432_p1), %v1485_v34, %v1453_v47  ;;  %v1455_v46 = vmul.f32 (!%p2432_p1), 0.00390625, %v1423_v4  ;;  %v1488_v23 = vld [vmem:[#allocation3 + $0x20] sm:$0xff] (!%p2432_p1)  ;;  %1548 = vst.msk [vmem:[#allocation3] sm:$0xff] (!%p2432_p1), %vm1383_vm2, %v1516_v3  ;;  %v1503_v3 = vld [vmem:[#allocation3 + $0x98] sm:$0xff] (!%p2432_p1) }
 0x200   : > { %v1456_v5 = vmul.f32 (!%p2432_p1), 0.00390625, %v1424_v7 }
 0x201   : > { %1400 = vst.msk [vmem:[#allocation2 + $0x80] sm:$0xff] %vm1383_vm2, %v1367_v15  ;;  %1399 = vst.msk [vmem:[#allocation2 + $0x78] sm:$0xff] %vm1383_vm2, %v1366_v38  ;;  %v1425_v15 = vld [vmem:[#allocation2 + $0x28] sm:$0xff] (!%p2432_p1) }
 0x202   : > { %v1324_v35 = vpop.xlane.xlu1 %1323  ;;  %v1322_v12 = vpop.xlane.xlu0 %1321  ;;  %v1489_v38 = vld [vmem:[#allocation3 + $0x28] sm:$0xff] (!%p2432_p1)  ;;  %1549 = vst.msk [vmem:[#allocation3 + $0x8] sm:$0xff] (!%p2432_p1), %vm1383_vm2, %v1517_v54 }
 0x203   : > { %v1369_v21 = vadd.f32 %v1324_v35, %v1273_v44  ;;  %v1368_v9 = vadd.f32 %v1322_v12, %v1272_v17  ;;  %v1518_v44 = vmax.f32 (!%p2432_p1), %v1486_v27, %v1454_v28  ;;  %v1457_v17 = vmul.f32 (!%p2432_p1), 0.00390625, %v1425_v15  ;;  %v1426_v35 = vld [vmem:[#allocation2 + $0x30] sm:$0xff] (!%p2432_p1) }
 0x204   : > { %v1490_v12 = vld [vmem:[#allocation3 + $0x30] sm:$0xff] (!%p2432_p1) }
 0x205   : > { %1402 = vst.msk [vmem:[#allocation2 + $0x90] sm:$0xff] %vm1383_vm2, %v1369_v21  ;;  %1401 = vst.msk [vmem:[#allocation2 + $0x88] sm:$0xff] %vm1383_vm2, %v1368_v9  ;;  %v1427_v21 = vld [vmem:[#allocation2 + $0x38] sm:$0xff] (!%p2432_p1)  ;;  %v1519_v9 = vmax.f32 (!%p2432_p1), %v1487_v60, %v1455_v46  ;;  %v1504_v46 = vld [vmem:[#allocation3 + $0xa0] sm:$0xff] (!%p2432_p1) }
 0x206   : > { %v1328_v45 = vpop.xlane.xlu1 %1327  ;;  %v1326_v22 = vpop.xlane.xlu0 %1325  ;;  %1550 = vst.msk [vmem:[#allocation3 + $0x10] sm:$0xff] (!%p2432_p1), %vm1383_vm2, %v1518_v44 }
 0x207   : > { %v1371_v19 = vadd.f32 %v1328_v45, %v1275_v0  ;;  %v1370_v40 = vadd.f32 %v1326_v22, %v1274_v1  ;;  %v1520_v0 = vmax.f32 (!%p2432_p1), %v1488_v23, %v1456_v5  ;;  %v1458_v1 = vmul.f32 (!%p2432_p1), 0.00390625, %v1426_v35  ;;  %v1491_v22 = vld [vmem:[#allocation3 + $0x38] sm:$0xff] (!%p2432_p1)  ;;  %1551 = vst.msk [vmem:[#allocation3 + $0x18] sm:$0xff] (!%p2432_p1), %vm1383_vm2, %v1519_v9  ;;  %v1506_v9 = vld [vmem:[#allocation3 + $0xb0] sm:$0xff] (!%p2432_p1) }
 0x208   : > { %v1459_v45 = vmul.f32 (!%p2432_p1), 0.00390625, %v1427_v21 }
 0x209   : > { %1404 = vst.msk [vmem:[#allocation2 + $0xa0] sm:$0xff] %vm1383_vm2, %v1371_v19  ;;  %1403 = vst.msk [vmem:[#allocation2 + $0x98] sm:$0xff] %vm1383_vm2, %v1370_v40  ;;  %v1428_v19 = vld [vmem:[#allocation2 + $0x40] sm:$0xff] (!%p2432_p1) }
 0x20a   : > { %v1332_v63 = vpop.xlane.xlu1 %1331  ;;  %v1330_v26 = vpop.xlane.xlu0 %1329  ;;  %v1492_v40 = vld [vmem:[#allocation3 + $0x40] sm:$0xff] (!%p2432_p1)  ;;  %1552 = vst.msk [vmem:[#allocation3 + $0x20] sm:$0xff] (!%p2432_p1), %vm1383_vm2, %v1520_v0 }
 0x20b   : > { %v1373_v25 = vadd.f32 %v1332_v63, %v1277_v16  ;;  %v1372_v42 = vadd.f32 %v1330_v26, %v1276_v18  ;;  %v1521_v16 = vmax.f32 (!%p2432_p1), %v1489_v38, %v1457_v17  ;;  %v1460_v18 = vmul.f32 (!%p2432_p1), 0.00390625, %v1428_v19  ;;  %v1429_v63 = vld [vmem:[#allocation2 + $0x48] sm:$0xff] (!%p2432_p1) }
 0x20c   : > { %v1493_v26 = vld [vmem:[#allocation3 + $0x48] sm:$0xff] (!%p2432_p1)  ;;  %v1438_v34 = vld [vmem:[#allocation2 + $0x90] sm:$0xff] (!%p2432_p1) }
 0x20d   : > { %1406 = vst.msk [vmem:[#allocation2 + $0xb0] sm:$0xff] %vm1383_vm2, %v1373_v25  ;;  %1405 = vst.msk [vmem:[#allocation2 + $0xa8] sm:$0xff] %vm1383_vm2, %v1372_v42  ;;  %v1430_v25 = vld [vmem:[#allocation2 + $0x50] sm:$0xff] (!%p2432_p1)  ;;  %v1522_v42 = vmax.f32 (!%p2432_p1), %v1490_v12, %v1458_v1  ;;  %v1437_v36 = vld [vmem:[#allocation2 + $0x88] sm:$0xff] (!%p2432_p1)  ;;  %v1470_v60 = vmul.f32 (!%p2432_p1), 0.00390625, %v1438_v34 }
 0x20e   : > { %v1336_v13 = vpop.xlane.xlu1 %1335  ;;  %v1334_v52 = vpop.xlane.xlu0 %1333  ;;  %1553 = vst.msk [vmem:[#allocation3 + $0x28] sm:$0xff] (!%p2432_p1), %vm1383_vm2, %v1521_v16  ;;  %v1469_v47 = vmul.f32 (!%p2432_p1), 0.00390625, %v1437_v36  ;;  %v1505_v38 = vld [vmem:[#allocation3 + $0xa8] sm:$0xff] (!%p2432_p1)  ;;  %v1507_v1 = vld [vmem:[#allocation3 + $0xb8] sm:$0xff] (!%p2432_p1) }
 0x20f   : > { %v1375_v43 = vadd.f32 %v1336_v13, %v1279_v59  ;;  %v1374_v56 = vadd.f32 %v1334_v52, %v1278_v29  ;;  %v1523_v59 = vmax.f32 (!%p2432_p1), %v1491_v22, %v1459_v45  ;;  %v1461_v29 = vmul.f32 (!%p2432_p1), 0.00390625, %v1429_v63  ;;  %v1494_v52 = vld [vmem:[#allocation3 + $0x50] sm:$0xff] (!%p2432_p1)  ;;  %1554 = vst.msk [vmem:[#allocation3 + $0x30] sm:$0xff] (!%p2432_p1), %vm1383_vm2, %v1522_v42  ;;  %v1509_v42 = vld [vmem:[#allocation3 + $0xc8] sm:$0xff] (!%p2432_p1) }
 0x210   : > { %v1462_v13 = vmul.f32 (!%p2432_p1), 0.00390625, %v1430_v25  ;;  %v1439_v27 = vld [vmem:[#allocation2 + $0x98] sm:$0xff] (!%p2432_p1)  ;;  %v1440_v54 = vld [vmem:[#allocation2 + $0xa0] sm:$0xff] (!%p2432_p1)  ;;  %v1533_v5 = vmax.f32 (!%p2432_p1), %v1501_v53, %v1469_v47  ;;  %v1534_v17 = vmax.f32 (!%p2432_p1), %v1502_v58, %v1470_v60 }
 0x211   : > { %1408 = vst.msk [vmem:[#allocation2 + $0xc0] sm:$0xff] %vm1383_vm2, %v1375_v43  ;;  %1407 = vst.msk [vmem:[#allocation2 + $0xb8] sm:$0xff] %vm1383_vm2, %v1374_v56  ;;  %v1431_v43 = vld [vmem:[#allocation2 + $0x58] sm:$0xff] (!%p2432_p1)  ;;  %v1471_v7 = vmul.f32 (!%p2432_p1), 0.00390625, %v1439_v27  ;;  %v1472_v23 = vmul.f32 (!%p2432_p1), 0.00390625, %v1440_v54 }
 0x212   : > { %v1340_v39 = vpop.xlane.xlu1 %1339  ;;  %v1338_v14 = vpop.xlane.xlu0 %1337  ;;  %v1495_v56 = vld [vmem:[#allocation3 + $0x58] sm:$0xff] (!%p2432_p1)  ;;  %1555 = vst.msk [vmem:[#allocation3 + $0x38] sm:$0xff] (!%p2432_p1), %vm1383_vm2, %v1523_v59  ;;  %1565 = vst.msk [vmem:[#allocation3 + $0x88] sm:$0xff] (!%p2432_p1), %vm1383_vm2, %v1533_v5 }
 0x213   : > { %v1377_v37 = vadd.f32 %v1340_v39, %v1281_v6  ;;  %v1376_v24 = vadd.f32 %v1338_v14, %v1280_v61  ;;  %v1524_v6 = vmax.f32 (!%p2432_p1), %v1492_v40, %v1460_v18  ;;  %v1463_v61 = vmul.f32 (!%p2432_p1), 0.00390625, %v1431_v43  ;;  %v1432_v39 = vld [vmem:[#allocation2 + $0x60] sm:$0xff] (!%p2432_p1)  ;;  %1566 = vst.msk [vmem:[#allocation3 + $0x90] sm:$0xff] (!%p2432_p1), %vm1383_vm2, %v1534_v17 }
 0x214   : > { %v1496_v14 = vld [vmem:[#allocation3 + $0x60] sm:$0xff] (!%p2432_p1)  ;;  %v1441_v15 = vld [vmem:[#allocation2 + $0xa8] sm:$0xff] (!%p2432_p1)  ;;  %v1442_v44 = vld [vmem:[#allocation2 + $0xb0] sm:$0xff] (!%p2432_p1)  ;;  %v1535_v35 = vmax.f32 (!%p2432_p1), %v1503_v3, %v1471_v7  ;;  %v1536_v45 = vmax.f32 (!%p2432_p1), %v1504_v46, %v1472_v23 }
 0x215   : > { %1410 = vst.msk [vmem:[#allocation2 + $0xd0] sm:$0xff] %vm1383_vm2, %v1377_v37  ;;  %1409 = vst.msk [vmem:[#allocation2 + $0xc8] sm:$0xff] %vm1383_vm2, %v1376_v24  ;;  %v1433_v37 = vld [vmem:[#allocation2 + $0x68] sm:$0xff] (!%p2432_p1)  ;;  %v1525_v24 = vmax.f32 (!%p2432_p1), %v1493_v26, %v1461_v29  ;;  %v1473_v12 = vmul.f32 (!%p2432_p1), 0.00390625, %v1441_v15  ;;  %v1474_v21 = vmul.f32 (!%p2432_p1), 0.00390625, %v1442_v44  ;;  %v1508_v40 = vld [vmem:[#allocation3 + $0xc0] sm:$0xff] (!%p2432_p1) }
 0x216   : > { %v1344_v41 = vpop.xlane.xlu1 %1343  ;;  %v1342_v50 = vpop.xlane.xlu0 %1341  ;;  %1556 = vst.msk [vmem:[#allocation3 + $0x40] sm:$0xff] (!%p2432_p1), %vm1383_vm2, %v1524_v6  ;;  %1567 = vst.msk [vmem:[#allocation3 + $0x98] sm:$0xff] (!%p2432_p1), %vm1383_vm2, %v1535_v35  ;;  %v1510_v29 = vld [vmem:[#allocation3 + $0xd0] sm:$0xff] (!%p2432_p1) }
 0x217   : > { %v1379_v57 = vadd.f32 %v1344_v41, %v1283_v49  ;;  %v1378_v33 = vadd.f32 %v1342_v50, %v1282_v55  ;;  %v1526_v49 = vmax.f32 (!%p2432_p1), %v1494_v52, %v1462_v13  ;;  %v1464_v55 = vmul.f32 (!%p2432_p1), 0.00390625, %v1432_v39  ;;  %v1497_v50 = vld [vmem:[#allocation3 + $0x68] sm:$0xff] (!%p2432_p1)  ;;  %1557 = vst.msk [vmem:[#allocation3 + $0x48] sm:$0xff] (!%p2432_p1), %vm1383_vm2, %v1525_v24  ;;  %1568 = vst.msk [vmem:[#allocation3 + $0xa0] sm:$0xff] (!%p2432_p1), %vm1383_vm2, %v1536_v45  ;;  %v1512_v24 = vld [vmem:[#allocation3 + $0xe0] sm:$0xff] (!%p2432_p1) }
 0x218   : > { %v1465_v41 = vmul.f32 (!%p2432_p1), 0.00390625, %v1433_v37  ;;  %v1443_v0 = vld [vmem:[#allocation2 + $0xb8] sm:$0xff] (!%p2432_p1)  ;;  %v1444_v19 = vld [vmem:[#allocation2 + $0xc0] sm:$0xff] (!%p2432_p1)  ;;  %v1537_v18 = vmax.f32 (!%p2432_p1), %v1505_v38, %v1473_v12  ;;  %v1538_v63 = vmax.f32 (!%p2432_p1), %v1506_v9, %v1474_v21 }
 0x219   : > { %1412 = vst.msk [vmem:[#allocation2 + $0xe0] sm:$0xff] %vm1383_vm2, %v1379_v57  ;;  %1411 = vst.msk [vmem:[#allocation2 + $0xd8] sm:$0xff] %vm1383_vm2, %v1378_v33  ;;  %v1434_v57 = vld [vmem:[#allocation2 + $0x70] sm:$0xff] (!%p2432_p1)  ;;  %v1475_v22 = vmul.f32 (!%p2432_p1), 0.00390625, %v1443_v0  ;;  %v1476_v26 = vmul.f32 (!%p2432_p1), 0.00390625, %v1444_v19 }
 0x21a   : > { %v1348_v8 = vpop.xlane.xlu1 %1347  ;;  %v1346_v2 = vpop.xlane.xlu0 %1345  ;;  %v1498_v33 = vld [vmem:[#allocation3 + $0x70] sm:$0xff] (!%p2432_p1)  ;;  %1558 = vst.msk [vmem:[#allocation3 + $0x50] sm:$0xff] (!%p2432_p1), %vm1383_vm2, %v1526_v49  ;;  %1569 = vst.msk [vmem:[#allocation3 + $0xa8] sm:$0xff] (!%p2432_p1), %vm1383_vm2, %v1537_v18 }
 0x21b   : > { %v1381_v62 = vadd.f32 %v1348_v8, %v1285_v51  ;;  %v1380_v48 = vadd.f32 %v1346_v2, %v1284_v10  ;;  %1419 = sbr.rel (%p2432_p1) target bundleno = 558 (0x22e), region = 102  ;;  %v1527_v51 = vmax.f32 (!%p2432_p1), %v1495_v56, %v1463_v61  ;;  %v1466_v10 = vmul.f32 (!%p2432_p1), 0.00390625, %v1434_v57  ;;  %v1435_v8 = vld [vmem:[#allocation2 + $0x78] sm:$0xff] (!%p2432_p1)  ;;  %1570 = vst.msk [vmem:[#allocation3 + $0xb0] sm:$0xff] (!%p2432_p1), %vm1383_vm2, %v1538_v63 }
 0x21c   : > { %v1499_v2 = vld [vmem:[#allocation3 + $0x78] sm:$0xff] (!%p2432_p1)  ;;  %v1445_v16 = vld [vmem:[#allocation2 + $0xc8] sm:$0xff] (!%p2432_p1)  ;;  %v1446_v59 = vld [vmem:[#allocation2 + $0xd0] sm:$0xff] (!%p2432_p1)  ;;  %v1539_v13 = vmax.f32 (!%p2432_p1), %v1507_v1, %v1475_v22  ;;  %v1540_v61 = vmax.f32 (!%p2432_p1), %v1508_v40, %v1476_v26 }
 0x21d   : > { %1414 = vst.msk [vmem:[#allocation2 + $0xf0] sm:$0xff] %vm1383_vm2, %v1381_v62  ;;  %1413 = vst.msk [vmem:[#allocation2 + $0xe8] sm:$0xff] %vm1383_vm2, %v1380_v48  ;;  %v1436_v62 = vld [vmem:[#allocation2 + $0x80] sm:$0xff] (!%p2432_p1)  ;;  %v1528_v48 = vmax.f32 (!%p2432_p1), %v1496_v14, %v1464_v55  ;;  %v1530_v32 = vmax.f32 (!%p2432_p1), %v1498_v33, %v1466_v10  ;;  %v1477_v25 = vmul.f32 (!%p2432_p1), 0.00390625, %v1445_v16  ;;  %v1478_v52 = vmul.f32 (!%p2432_p1), 0.00390625, %v1446_v59  ;;  %v1511_v56 = vld [vmem:[#allocation3 + $0xd8] sm:$0xff] (!%p2432_p1) }
 0x21e   : > { %v1350_v20 = vpop.xlane.xlu0 %1349  ;;  %1559 = vst.msk [vmem:[#allocation3 + $0x58] sm:$0xff] (!%p2432_p1), %vm1383_vm2, %v1527_v51  ;;  %v1513_v55 = vld [vmem:[#allocation3 + $0xe8] sm:$0xff] (!%p2432_p1)  ;;  %1571 = vst.msk [vmem:[#allocation3 + $0xb8] sm:$0xff] (!%p2432_p1), %vm1383_vm2, %v1539_v13  ;;  %v1514_v33 = vld [vmem:[#allocation3 + $0xf0] sm:$0xff] (!%p2432_p1) }
 0x21f   : > { %v1382_v31 = vadd.f32 %v1350_v20, %v1286_v30  ;;  %v1529_v30 = vmax.f32 (!%p2432_p1), %v1497_v50, %v1465_v41  ;;  %v1467_v20 = vmul.f32 (!%p2432_p1), 0.00390625, %v1435_v8  ;;  %1560 = vst.msk [vmem:[#allocation3 + $0x60] sm:$0xff] (!%p2432_p1), %vm1383_vm2, %v1528_v48  ;;  %1562 = vst.msk [vmem:[#allocation3 + $0x70] sm:$0xff] (!%p2432_p1), %vm1383_vm2, %v1530_v32  ;;  %v1541_v39 = vmax.f32 (!%p2432_p1), %v1509_v42, %v1477_v25  ;;  %v1515_v48 = vld [vmem:[#allocation3 + $0xf8] sm:$0xff] (!%p2432_p1) }
 0x220   : > { %v1447_v43 = vld [vmem:[#allocation2 + $0xd8] sm:$0xff] (!%p2432_p1)  ;;  %v1448_v6 = vld [vmem:[#allocation2 + $0xe0] sm:$0xff] (!%p2432_p1)  ;;  %v1542_v41 = vmax.f32 (!%p2432_p1), %v1510_v29, %v1478_v52  ;;  %1572 = vst.msk [vmem:[#allocation3 + $0xc0] sm:$0xff] (!%p2432_p1), %vm1383_vm2, %v1540_v61 }
 0x221   : > { %1415 = vst.msk [vmem:[#allocation2 + $0xf8] sm:$0xff] %vm1383_vm2, %v1382_v31  ;;  %v1468_v31 = vmul.f32 (!%p2432_p1), 0.00390625, %v1436_v62  ;;  %1561 = vst.msk [vmem:[#allocation3 + $0x68] sm:$0xff] (!%p2432_p1), %vm1383_vm2, %v1529_v30  ;;  %v1531_v28 = vmax.f32 (!%p2432_p1), %v1499_v2, %v1467_v20  ;;  %v1479_v14 = vmul.f32 (!%p2432_p1), 0.00390625, %v1447_v43  ;;  %v1480_v37 = vmul.f32 (!%p2432_p1), 0.00390625, %v1448_v6 }
 0x222   : > { %1573 = vst.msk [vmem:[#allocation3 + $0xc8] sm:$0xff] %vm1383_vm2, %v1541_v39  ;;  %1574 = vst.msk [vmem:[#allocation3 + $0xd0] sm:$0xff] %vm1383_vm2, %v1542_v41 }
 0x223   : > { %v1532_v4 = vmax.f32 %v1500_v11, %v1468_v31  ;;  %1563 = vst.msk [vmem:[#allocation3 + $0x78] sm:$0xff] %vm1383_vm2, %v1531_v28  ;;  %v1543_v10 = vmax.f32 %v1511_v56, %v1479_v14  ;;  %v1544_v8 = vmax.f32 %v1512_v24, %v1480_v37 }
 0x224   : > { %v1449_v49 = vld [vmem:[#allocation2 + $0xe8] sm:$0xff]  ;;  %v1450_v57 = vld [vmem:[#allocation2 + $0xf0] sm:$0xff] }
 0x225   : > { %1564 = vst.msk [vmem:[#allocation3 + $0x80] sm:$0xff] %vm1383_vm2, %v1532_v4  ;;  %v1481_v50 = vmul.f32 0.00390625, %v1449_v49  ;;  %v1482_v2 = vmul.f32 0.00390625, %v1450_v57  ;;  %1575 = vst.msk [vmem:[#allocation3 + $0xd8] sm:$0xff] %vm1383_vm2, %v1543_v10 }
 0x226   : > { %1576 = vst.msk [vmem:[#allocation3 + $0xe0] sm:$0xff] %vm1383_vm2, %v1544_v8 }
 0x227   : > { %v1545_v30 = vmax.f32 %v1513_v55, %v1481_v50  ;;  %v1546_v20 = vmax.f32 %v1514_v33, %v1482_v2 }
 0x228   : > { %v1451_v51 = vld [vmem:[#allocation2 + $0xf8] sm:$0xff] }
 0x229   : > { %v1483_v62 = vmul.f32 0.00390625, %v1451_v51  ;;  %1577 = vst.msk [vmem:[#allocation3 + $0xe8] sm:$0xff] %vm1383_vm2, %v1545_v30  ;;  %1578 = vst.msk [vmem:[#allocation3 + $0xf0] sm:$0xff] %vm1383_vm2, %v1546_v20 }
 0x22b   : > { %v1547_v31 = vmax.f32 %v1515_v48, %v1483_v62 }
 0x22d   : > { %1579 = vst.msk [vmem:[#allocation3 + $0xf8] sm:$0xff] %vm1383_vm2, %v1547_v31 }
 0x22e PF: > { %p1580_p2 = scmp.eq.s32.totalorder %s2720_s12, 2 }
 0x230   : > { %p1581_p3 = pnand %p1580_p2, %p1416_p0 }
 0x231   : > { %v1601_v11 = vld [vmem:[#allocation3 + $0x80] sm:$0xff] (!%p1581_p3)  ;;  %v1602_v36 = vld [vmem:[#allocation3 + $0x88] sm:$0xff] (!%p1581_p3)  ;;  %v2737_v32 = vmov (!%p1581_p3), 0   ;;  %v1603_v27 = vld [vmem:[#allocation3 + $0x90] sm:$0xff] (!%p1581_p3)  ;;  %v2738_v2 = vmov (!%p1581_p3), 0.0   ;;  %vm2739_vm3 = vmmov (!%p1581_p3), 0  }
 0x232   : > { %1584 = sbr.rel (%p1581_p3) target bundleno = 1412 (0x584), region = 106  ;;  %v1585_v53 = vld [vmem:[#allocation3] sm:$0xff] (!%p1581_p3)  ;;  %2623 = vset.pattern.permute.xlu1 (!%p1581_p3), %v2737_v32  ;;  %2622 = vset.pattern.permute.xlu0 (!%p1581_p3), %v2737_v32  ;;  %v1625_v47 = vpack.c.bf16 (!%p1581_p3), %v1602_v36, %v1601_v11  ;;  %v1586_v34 = vld [vmem:[#allocation3 + $0x8] sm:$0xff] (!%p1581_p3)  ;;  %v1604_v28 = vld [vmem:[#allocation3 + $0x98] sm:$0xff] (!%p1581_p3)  ;;  %vm1811_vm4 = vcmask (!%p1581_p3), 130112   ;;  %vm1818_vm5 = vcmask (!%p1581_p3), 195712  }
 0x233   : > { %v1617_v58 = vpack.c.bf16 (!%p1581_p3), %v1586_v34, %v1585_v53  ;;  %v1587_v60 = vld [vmem:[#allocation3 + $0x10] sm:$0xff] (!%p1581_p3)  ;;  %v1588_v7 = vld [vmem:[#allocation3 + $0x18] sm:$0xff] (!%p1581_p3)  ;;  %v1626_v46 = vpack.c.bf16 (!%p1581_p3), %v1604_v28, %v1603_v27  ;;  %v1605_v38 = vld [vmem:[#allocation3 + $0xa0] sm:$0xff] (!%p1581_p3)  ;;  %2491 = vmatprep.subr.bf16.mxu0 (!%p1581_p3), %v2738_v2  ;;  %2511 = vmatprep.subr.bf16.mxu1 (!%p1581_p3), %v2738_v2  ;;  %vm1825_vm6 = vcmask (!%p1581_p3), 261312   ;;  %vm1832_vm7 = vcmask (!%p1581_p3), 326912  }
 0x234   : > { %v1688_v4 = vunpack.c.l.b16 (!%p1581_p3), %v1625_v47  ;;  %v1689_v54 = vunpack.c.h.b16 (!%p1581_p3), %v1625_v47  ;;  %v1618_v23 = vpack.c.bf16 (!%p1581_p3), %v1588_v7, %v1587_v60  ;;  %v1606_v44 = vld [vmem:[#allocation3 + $0xa8] sm:$0xff] (!%p1581_p3)  ;;  %v1589_v35 = vld [vmem:[#allocation3 + $0x20] sm:$0xff] (!%p1581_p3)  ;;  %v1607_v45 = vld [vmem:[#allocation3 + $0xb0] sm:$0xff] (!%p1581_p3)  ;;  %2507 = vmatprep.mubr.msk.bf16.mxu0 (!%p1581_p3), %vm2739_vm3, %v2738_v2  ;;  %2527 = vmatprep.mubr.msk.bf16.mxu1 (!%p1581_p3), %vm2739_vm3, %v2738_v2  ;;  %vm1839_vm8 = vcmask (!%p1581_p3), 392512  }
 0x235   : > { %v1672_v3 = vunpack.c.l.b16 (!%p1581_p3), %v1617_v58  ;;  %v1673_v5 = vunpack.c.h.b16 (!%p1581_p3), %v1617_v58  ;;  %v1690_v15 = vunpack.c.l.b16 (!%p1581_p3), %v1626_v46  ;;  %v1590_v12 = vld [vmem:[#allocation3 + $0x28] sm:$0xff] (!%p1581_p3)  ;;  %v1691_v21 = vunpack.c.h.b16 (!%p1581_p3), %v1626_v46  ;;  %v1608_v22 = vld [vmem:[#allocation3 + $0xb8] sm:$0xff] (!%p1581_p3)  ;;  %v1591_v40 = vld [vmem:[#allocation3 + $0x30] sm:$0xff] (!%p1581_p3) }
 0x236   : > { %1753 = vperm.xlu1 (!%p1581_p3), %2623, %v1688_v4   ;;  %v1674_v17 = vunpack.c.l.b16 (!%p1581_p3), %v1618_v23  ;;  %v1627_v9 = vpack.c.bf16 (!%p1581_p3), %v1606_v44, %v1605_v38  ;;  %v1675_v0 = vunpack.c.h.b16 (!%p1581_p3), %v1618_v23  ;;  %v1619_v1 = vpack.c.bf16 (!%p1581_p3), %v1590_v12, %v1589_v35  ;;  %v1592_v18 = vld [vmem:[#allocation3 + $0x38] sm:$0xff] (!%p1581_p3)  ;;  %v1609_v59 = vld [vmem:[#allocation3 + $0xc0] sm:$0xff] (!%p1581_p3)  ;;  %v1610_v29 = vld [vmem:[#allocation3 + $0xc8] sm:$0xff] (!%p1581_p3) }
 0x237   : > { %1705 = vperm.xlu0 (!%p1581_p3), %2622, %v1672_v3   ;;  %v1628_v26 = vpack.c.bf16 (!%p1581_p3), %v1608_v22, %v1607_v45  ;;  %v1620_v42 = vpack.c.bf16 (!%p1581_p3), %v1592_v18, %v1591_v40  ;;  %v1593_v52 = vld [vmem:[#allocation3 + $0x40] sm:$0xff] (!%p1581_p3)  ;;  %v1594_v56 = vld [vmem:[#allocation3 + $0x48] sm:$0xff] (!%p1581_p3)  ;;  %v1629_v61 = vpack.c.bf16 (!%p1581_p3), %v1610_v29, %v1609_v59  ;;  %v1611_v49 = vld [vmem:[#allocation3 + $0xd0] sm:$0xff] (!%p1581_p3)  ;;  %vm1846_vm9 = vcmask (!%p1581_p3), 458112  }
 0x238   : > { %v1692_v19 = vunpack.c.l.b16 (!%p1581_p3), %v1627_v9  ;;  %v1676_v16 = vunpack.c.l.b16 (!%p1581_p3), %v1619_v1  ;;  %v1693_v63 = vunpack.c.h.b16 (!%p1581_p3), %v1627_v9  ;;  %v1677_v25 = vunpack.c.h.b16 (!%p1581_p3), %v1619_v1  ;;  %v1612_v55 = vld [vmem:[#allocation3 + $0xd8] sm:$0xff] (!%p1581_p3)  ;;  %v1595_v41 = vld [vmem:[#allocation3 + $0x50] sm:$0xff] (!%p1581_p3)  ;;  %v2624_v8 = vld [vmem:[%s4091_s3] sm:$0xff] (!%p1581_p3)  }
 0x239   : > { %v1694_v13 = vunpack.c.l.b16 %v1628_v26  ;;  %v1678_v43 = vunpack.c.l.b16 %v1620_v42  ;;  %v1695_v6 = vunpack.c.h.b16 %v1628_v26  ;;  %v1679_v39 = vunpack.c.h.b16 %v1620_v42  ;;  %v1596_v50 = vld [vmem:[#allocation3 + $0x58] sm:$0xff]  ;;  %2492 = vmatpush3.bf16.msra.mxu0 %v2624_v8  ;;  %v1613_v30 = vld [vmem:[#allocation3 + $0xe0] sm:$0xff]  ;;  %v1614_v20 = vld [vmem:[#allocation3 + $0xe8] sm:$0xff] }
 0x23a   : > { %1756 = vperm.xlu1 %2623, %v1689_v54   ;;  %v1621_v14 = vpack.c.bf16 %v1594_v56, %v1593_v52  ;;  %v1696_v37 = vunpack.c.l.b16 %v1629_v61  ;;  %v1697_v57 = vunpack.c.h.b16 %v1629_v61  ;;  %v1630_v33 = vpack.c.bf16 %v1612_v55, %v1611_v49  ;;  %2493 = vmatprep.subr.bf16.mxu0 %v2738_v2  ;;  %v1597_v31 = vld [vmem:[#allocation3 + $0x60] sm:$0xff]  ;;  %v1598_v11 = vld [vmem:[#allocation3 + $0x68] sm:$0xff]  ;;  %v2626_v58 = vld [vmem:[%s4091_s3 + $0x10] sm:$0xff]  }
 0x23b   : > { %1708 = vperm.xlu0 %2622, %v1673_v5   ;;  %v1622_v10 = vpack.c.bf16 %v1596_v50, %v1595_v41  ;;  %v2625_v36 = vld [vmem:[%s4091_s3 + $0x8] sm:$0xff]   ;;  %v1631_v32 = vpack.c.bf16 %v1614_v20, %v1613_v30  ;;  %v1623_v34 = vpack.c.bf16 %v1598_v11, %v1597_v31  ;;  %v1615_v4 = vld [vmem:[#allocation3 + $0xf0] sm:$0xff]  ;;  %v1616_v60 = vld [vmem:[#allocation3 + $0xf8] sm:$0xff]  ;;  %v4172_v49 = vlaneseq }
 0x23c   : > { %v1680_v24 = vunpack.c.l.b16 %v1621_v14  ;;  %v1681_v51 = vunpack.c.h.b16 %v1621_v14  ;;  %v1698_v62 = vunpack.c.l.b16 %v1630_v33  ;;  %v1699_v53 = vunpack.c.h.b16 %v1630_v33  ;;  %v1599_v7 = vld [vmem:[#allocation3 + $0x70] sm:$0xff]  ;;  %v1600_v3 = vld [vmem:[#allocation3 + $0x78] sm:$0xff]  ;;  %v2628_v38 = vld [vmem:[%s4091_s3 + $0x20] sm:$0xff]  }
 0x23d   : > { %v1682_v48 = vunpack.c.l.b16 %v1622_v10  ;;  %2494 = vmatpush3.bf16.msra.mxu0 %v2625_v36  ;;  %v1683_v47 = vunpack.c.h.b16 %v1622_v10  ;;  %v1700_v27 = vunpack.c.l.b16 %v1631_v32  ;;  %v1684_v28 = vunpack.c.l.b16 %v1623_v34  ;;  %v2627_v54 = vld [vmem:[%s4091_s3 + $0x18] sm:$0xff]   ;;  %v2629_v35 = vld [vmem:[%s4091_s3 + $0x28] sm:$0xff]   ;;  %v2630_v9 = vld [vmem:[%s4091_s3 + $0x30] sm:$0xff]  }
 0x23e   : > { %1759 = vperm.xlu1 %2623, %v1690_v15   ;;  %2495 = vmatprep.subr.bf16.mxu0 %v2738_v2  ;;  %v1701_v46 = vunpack.c.h.b16 %v1631_v32  ;;  %v1632_v5 = vpack.c.bf16 %v1616_v60, %v1615_v4  ;;  %v1685_v23 = vunpack.c.h.b16 %v1623_v34  ;;  %v1624_v15 = vpack.c.bf16 %v1600_v3, %v1599_v7  ;;  %v2632_v1 = vld [vmem:[%s4093_s5] sm:$0xff]   ;;  %v2633_v45 = vld [vmem:[%s4093_s5 + $0x8] sm:$0xff]   ;;  %v2634_v22 = vld [vmem:[%s4093_s5 + $0x10] sm:$0xff]  }
 0x23f   : > { %1711 = vperm.xlu0 %2622, %v1674_v17   ;;  %2512 = vmatpush3.bf16.msra.mxu1 %v2632_v1  ;;  %v2636_v40 = vld [vmem:[%s4093_s5 + $0x20] sm:$0xff]   ;;  %v1801_v55 = vand.u32 127, %v4172_v49  ;;  %vm1853_vm10 = vcmask 523712   ;;  %vm1860_vm11 = vcmask 589312   ;;  %vm1867_vm12 = vcmask 654912  }
 0x240   : > { %v1702_v44 = vunpack.c.l.b16 %v1632_v5  ;;  %v1686_v17 = vunpack.c.l.b16 %v1624_v15  ;;  %v1703_v12 = vunpack.c.h.b16 %v1632_v5  ;;  %2513 = vmatprep.subr.bf16.mxu1 %v2738_v2  ;;  %vm1874_vm13 = vcmask 720512  }
 0x241   : > { %2496 = vmatpush3.bf16.msra.mxu0 %v2626_v58  ;;  %v1806_v50 = vadd.s32 4294967288, %v1801_v55  ;;  %v1827_v10 = vadd.s32 4294967264, %v1801_v55  ;;  %v1834_v30 = vadd.s32 4294967256, %v1801_v55  ;;  %v1841_v31 = vadd.s32 4294967248, %v1801_v55 }
 0x242   : > { %1762 = vperm.xlu1 %2623, %v1691_v21   ;;  %2497 = vmatprep.subr.bf16.mxu0 %v2738_v2  ;;  %v1687_v21 = vunpack.c.h.b16 %v1624_v15  ;;  %v1848_v36 = vadd.s32 4294967240, %v1801_v55  ;;  %v1862_v58 = vadd.s32 4294967224, %v1801_v55  ;;  %v1876_v60 = vadd.s32 4294967208, %v1801_v55 }
 0x243   : > { %1714 = vperm.xlu0 %2622, %v1675_v0   ;;  %v2631_v0 = vld [vmem:[%s4091_s3 + $0x38] sm:$0xff]   ;;  %2514 = vmatpush3.bf16.msra.mxu1 %v2633_v45  ;;  %v1883_v7 = vadd.s32 4294967200, %v1801_v55  ;;  %v1897_v15 = vadd.s32 4294967184, %v1801_v55  ;;  %vm1881_vm14 = vcmask 786112   ;;  %vm1888_vm15 = vcmask 851712  }
 0x244   : > { %2515 = vmatprep.subr.bf16.mxu1 %v2738_v2  ;;  %vm1895_vm0 = vcmask 917312   ;;  %vm1902_vm1 = vcmask 982912   ;;  %vm1909_vm2 = vcmask 1048512  }
 0x245   : > { %2498 = vmatpush3.bf16.msra.mxu0 %v2627_v54  ;;  %v1890_v54 = vadd.s32 4294967192, %v1801_v55 }
 0x246   : > { %1765 = vperm.xlu1 %2623, %v1692_v19   ;;  %2499 = vmatprep.subr.bf16.mxu0 %v2738_v2  ;;  %v2635_v19 = vld [vmem:[%s4093_s5 + $0x18] sm:$0xff]  }
 0x247   : > { %1717 = vperm.xlu0 %2622, %v1676_v16   ;;  %2516 = vmatpush3.bf16.msra.mxu1 %v2634_v22  ;;  %v2637_v16 = vld [vmem:[%s4093_s5 + $0x28] sm:$0xff]  }
 0x248   : > { %2517 = vmatprep.subr.bf16.mxu1 %v2738_v2 }
 0x249   : > { %2500 = vmatpush3.bf16.msra.mxu0 %v2628_v38 }
 0x24a   : > { %1768 = vperm.xlu1 %2623, %v1693_v63   ;;  %2501 = vmatprep.subr.bf16.mxu0 %v2738_v2 }
 0x24b   : > { %1720 = vperm.xlu0 %2622, %v1677_v25   ;;  %2518 = vmatpush3.bf16.msra.mxu1 %v2635_v19 }
 0x24c   : > { %2519 = vmatprep.subr.bf16.mxu1 %v2738_v2 }
 0x24d   : > { %2502 = vmatpush3.bf16.msra.mxu0 %v2629_v35 }
 0x24e   : > { %1771 = vperm.xlu1 %2623, %v1694_v13   ;;  %2503 = vmatprep.subr.bf16.mxu0 %v2738_v2 }
 0x24f   : > { %1723 = vperm.xlu0 %2622, %v1678_v43   ;;  %2520 = vmatpush3.bf16.msra.mxu1 %v2636_v40 }
 0x250   : > { %2521 = vmatprep.subr.bf16.mxu1 %v2738_v2 }
 0x251   : > { %2504 = vmatpush3.bf16.msra.mxu0 %v2630_v9 }
 0x252   : > { %1774 = vperm.xlu1 %2623, %v1695_v6   ;;  %2505 = vmatprep.subr.bf16.mxu0 %v2738_v2 }
 0x253   : > { %1726 = vperm.xlu0 %2622, %v1679_v39   ;;  %2522 = vmatpush3.bf16.msra.mxu1 %v2637_v16 }
 0x254   : > { %2523 = vmatprep.subr.bf16.mxu1 %v2738_v2 }
 0x255   : > { %2506 = vmatpush3.bf16.msra.mxu0 %v2631_v0 }
 0x256   : > { %1777 = vperm.xlu1 %2623, %v1696_v37   ;;  %2531 = vmatprep.subr.bf16.mxu0 %v2738_v2 }
 0x257   : > { %1729 = vperm.xlu0 %2622, %v1680_v24  }
 0x25a   : > { %1780 = vperm.xlu1 %2623, %v1697_v57   ;;  %v1813_v57 = vadd.s32 4294967280, %v1801_v55 }
 0x25b   : > { %1732 = vperm.xlu0 %2622, %v1681_v51   ;;  %v1820_v51 = vadd.s32 4294967272, %v1801_v55 }
 0x25e   : > { %1783 = vperm.xlu1 %2623, %v1698_v62   ;;  %v4173_v62 = vld [vmem:[#allocation9_spill] sm:$0xff] }
 0x25f   : > { %1735 = vperm.xlu0 %2622, %v1682_v48   ;;  %v1804_v48 = vsub.s32 %v1801_v55, %v4173_v62  ;;  %v1809_v20 = vsub.s32 %v1806_v50, %v4173_v62  ;;  %v1816_v11 = vsub.s32 %v1813_v57, %v4173_v62  ;;  %v1830_v34 = vsub.s32 %v1827_v10, %v4173_v62 }
 0x260   : > { %v1837_v4 = vsub.s32 %v1834_v30, %v4173_v62  ;;  %v1844_v3 = vsub.s32 %v1841_v31, %v4173_v62  ;;  %v3917_v0 = vsub.s32 %v1876_v60, %v4173_v62  ;;  %v3920_v1 = vsub.s32 %v1883_v7, %v4173_v62 }
 0x261   : > { %v3926_v40 = vsub.s32 %v1890_v54, %v4173_v62  ;;  %v3932_v49 = vsub.s32 %v1897_v15, %v4173_v62 }
 0x262   : > { %1786 = vperm.xlu1 %2623, %v1699_v53   ;;  %v1855_v53 = vadd.s32 4294967232, %v1801_v55 }
 0x263   : > { %1738 = vperm.xlu0 %2622, %v1683_v47   ;;  %v1823_v47 = vsub.s32 %v1820_v51, %v4173_v62 }
 0x264   : > { %v3901_v5 = vsub.s32 %v1855_v53, %v4173_v62 }
 0x266   : > { %1789 = vperm.xlu1 %2623, %v1700_v27   ;;  %v1869_v27 = vadd.s32 4294967216, %v1801_v55 }
 0x267   : > { %1741 = vperm.xlu0 %2622, %v1684_v28  }
 0x26a   : > { %1792 = vperm.xlu1 %2623, %v1701_v46   ;;  %v1851_v46 = vsub.s32 %v1848_v36, %v4173_v62 }
 0x26b   : > { %1744 = vperm.xlu0 %2622, %v1685_v23  }
 0x26e   : > { %1795 = vperm.xlu1 %2623, %v1702_v44   ;;  %v3907_v44 = vsub.s32 %v1862_v58, %v4173_v62 }
 0x26f   : > { %1747 = vperm.xlu0 %2622, %v1686_v17   ;;  %v3910_v17 = vsub.s32 %v1869_v27, %v4173_v62 }
 0x272   : > { %1798 = vperm.xlu1 %2623, %v1703_v12   ;;  %v1904_v12 = vadd.s32 4294967176, %v1801_v55 }
 0x273   : > { %1750 = vperm.xlu0 %2622, %v1687_v21  }
 0x274   : > { %v1907_v50 = vsub.s32 %v1904_v12, %v4173_v62 }
 0x2b5   : > { %v3847_v18 = vpop.permute.xlu1 %1753 }
 0x2b6   : > { %v3849_v63 = vpop.permute.xlu0 %1705  ;;  %v1914_v45 = vrot.slane %v3847_v18, %v1804_v48 }
 0x2b7   : > { %v1805_v16 = vrot.slane %v3849_v63, %v1804_v48 }
 0x2b9   : > { %v3851_v26 = vpop.permute.xlu1 %1756 }
 0x2ba   : > { %v3853_v25 = vpop.permute.xlu0 %1708  ;;  %v1918_v38 = vrot.slane %v3851_v26, %v1809_v20 }
 0x2bb   : > { %v1810_v21 = vrot.slane %v3853_v25, %v1809_v20 }
 0x2bc   : > { %v1919_v18 = vsel %vm1811_vm4, %v1918_v38, %v1914_v45 }
 0x2bd   : > { %v3855_v42 = vpop.permute.xlu1 %1759  ;;  %v1812_v63 = vsel %vm1811_vm4, %v1810_v21, %v1805_v16  ;;  %vm1990_vm4 = vcmask 1041409  }
 0x2be   : > { %v3857_v59 = vpop.permute.xlu0 %1711  ;;  %v1923_v9 = vrot.slane %v3855_v42, %v1816_v11 }
 0x2bf   : > { %v1817_v22 = vrot.slane %v3857_v59, %v1816_v11 }
 0x2c1   : > { %v3859_v29 = vpop.permute.xlu1 %1762  ;;  %v1819_v51 = vsel %vm1818_vm5, %v1817_v22, %v1812_v63  ;;  %v2643_v63 = vld [vmem:[%s4095_s7 + $0x18] sm:$0xff]  }
 0x2c2   : > { %v3861_v13 = vpop.permute.xlu0 %1714  ;;  %v1928_v19 = vrot.slane %v3859_v29, %v1823_v47 }
 0x2c3   : > { %v1824_v26 = vrot.slane %v3861_v13, %v1823_v47  ;;  %v1924_v13 = vsel %vm1818_vm5, %v1923_v9, %v1919_v18  ;;  %v2638_v18 = vld [vmem:[%s4093_s5 + $0x30] sm:$0xff]  }
 0x2c4   : > { %v1929_v10 = vsel %vm1825_vm6, %v1928_v19, %v1924_v13  ;;  %2524 = vmatpush3.bf16.msra.mxu1 %v2638_v18  ;;  %v2644_v13 = vld [vmem:[%s4095_s7 + $0x20] sm:$0xff]  }
 0x2c5   : > { %v3863_v52 = vpop.permute.xlu1 %1765  ;;  %v1826_v48 = vsel %vm1825_vm6, %v1824_v26, %v1819_v51  ;;  %2525 = vmatprep.subr.bf16.mxu1 %v2738_v2 }
 0x2c6   : > { %v3865_v43 = vpop.permute.xlu0 %1717  ;;  %v1933_v25 = vrot.slane %v3863_v52, %v1830_v34 }
 0x2c7   : > { %v1831_v59 = vrot.slane %v3865_v43, %v1830_v34 }
 0x2c8   : > { %v1934_v62 = vsel %vm1832_vm7, %v1933_v25, %v1929_v10 }
 0x2c9   : > { %v3867_v56 = vpop.permute.xlu1 %1768 }
 0x2ca   : > { %v3869_v6 = vpop.permute.xlu0 %1720  ;;  %v1938_v29 = vrot.slane %v3867_v56, %v1837_v4 }
 0x2cb   : > { %v1838_v52 = vrot.slane %v3869_v6, %v1837_v4 }
 0x2cc   : > { %v1939_v31 = vsel %vm1839_vm8, %v1938_v29, %v1934_v62  ;;  %v2640_v29 = vld [vmem:[%s4095_s7] sm:$0xff]  }
 0x2cd   : > { %v3871_v61 = vpop.permute.xlu1 %1771 }
 0x2ce   : > { %v3873_v39 = vpop.permute.xlu0 %1723  ;;  %v1943_v57 = vrot.slane %v3871_v61, %v1844_v3  ;;  %v1833_v61 = vsel %vm1832_vm7, %v1831_v59, %v1826_v48  ;;  %v2639_v59 = vld [vmem:[%s4093_s5 + $0x38] sm:$0xff]  }
 0x2cf   : > { %v1845_v43 = vrot.slane %v3873_v39, %v1844_v3  ;;  %v1840_v36 = vsel %vm1839_vm8, %v1838_v52, %v1833_v61  ;;  %2526 = vmatpush3.bf16.msra.mxu1 %v2639_v59  ;;  %v2645_v52 = vld [vmem:[%s4095_s7 + $0x28] sm:$0xff]   ;;  %v2442_v61 = vld [vmem:[%s4094_s6] ss:$0 sm:$0xff] }
 0x2d0   : > { %v1944_v53 = vsel %vm1846_vm9, %v1943_v57, %v1939_v31  ;;  %v2433_v57 = vld [vmem:[%s4092_s4] ss:$0 sm:$0xff] }
 0x2d1   : > { %v3875_v14 = vpop.permute.xlu1 %1774  ;;  %v1847_v47 = vsel %vm1846_vm9, %v1845_v43, %v1840_v36 }
 0x2d2   : > { %v3877_v37 = vpop.permute.xlu0 %1726  ;;  %v1948_v56 = vrot.slane %v3875_v14, %v1851_v46 }
 0x2d3   : > { %v1852_v30 = vrot.slane %v3877_v37, %v1851_v46 }
 0x2d4   : > { %v1949_v34 = vsel %vm1853_vm10, %v1948_v56, %v1944_v53 }
 0x2d5   : > { %v3879_v24 = vpop.permute.xlu1 %1777  ;;  %v1854_v58 = vsel %vm1853_vm10, %v1852_v30, %v1847_v47 }
 0x2d6   : > { %v3882_v41 = vpop.permute.xlu0 %1729  ;;  %v1953_v6 = vrot.slane %v3879_v24, %v3901_v5 }
 0x2d7   : > { %v1859_v11 = vrot.slane %v3882_v41, %v3901_v5 }
 0x2d8   : > { %v1954_v27 = vsel %vm1860_vm11, %v1953_v6, %v1949_v34  ;;  %v2646_v6 = vld [vmem:[%s4095_s7 + $0x30] sm:$0xff]  }
 0x2d9   : > { %v3884_v33 = vpop.permute.xlu1 %1780  ;;  %v1861_v60 = vsel %vm1860_vm11, %v1859_v11, %v1854_v58 }
 0x2da   : > { %v3886_v8 = vpop.permute.xlu0 %1732  ;;  %v1958_v39 = vrot.slane %v3884_v33, %v3907_v44 }
 0x2db   : > { %v1866_v37 = vrot.slane %v3886_v8, %v3907_v44 }
 0x2dc   : > { %v1959_v7 = vsel %vm1867_vm12, %v1958_v39, %v1954_v27 }
 0x2dd   : > { %v3891_v32 = vpop.permute.xlu1 %1783  ;;  %v1868_v46 = vsel %vm1867_vm12, %v1866_v37, %v1861_v60 }
 0x2de   : > { %v3895_v28 = vpop.permute.xlu0 %1735  ;;  %v1963_v24 = vrot.slane %v3891_v32, %v3910_v17 }
 0x2df   : > { %v1873_v41 = vrot.slane %v3895_v28, %v3910_v17 }
 0x2e0   : > { %v1964_v5 = vsel %vm1874_vm13, %v1963_v24, %v1959_v7 }
 0x2e1   : > { %v3903_v23 = vpop.permute.xlu1 %1786  ;;  %v1875_v38 = vsel %vm1874_vm13, %v1873_v41, %v1868_v46 }
 0x2e2   : > { %v3912_v35 = vpop.permute.xlu0 %1738  ;;  %v1968_v33 = vrot.slane %v3903_v23, %v3917_v0 }
 0x2e3   : > { %v1880_v8 = vrot.slane %v3912_v35, %v3917_v0 }
 0x2e4   : > { %v1969_v44 = vsel %vm1881_vm14, %v1968_v33, %v1964_v5 }
 0x2e5   : > { %v1790_v42 = vpop.permute.xlu1 %1789  ;;  %v1882_v35 = vsel %vm1881_vm14, %v1880_v8, %v1875_v38 }
 0x2e6   : > { %v1742_v55 = vpop.permute.xlu0 %1741  ;;  %v1973_v4 = vrot.slane %v1790_v42, %v3920_v1 }
 0x2e7   : > { %v1887_v3 = vrot.slane %v1742_v55, %v3920_v1  ;;  %v2641_v55 = vld [vmem:[%s4095_s7 + $0x8] sm:$0xff]  }
 0x2e8   : > { %v1974_v12 = vsel %vm1888_vm15, %v1973_v4, %v1969_v44 }
 0x2e9   : > { %v1793_v20 = vpop.permute.xlu1 %1792  ;;  %v1889_v9 = vsel %vm1888_vm15, %v1887_v3, %v1882_v35 }
 0x2ea   : > { %v1745_v14 = vpop.permute.xlu0 %1744  ;;  %v1978_v28 = vrot.slane %v1793_v20, %v3926_v40  ;;  %v2647_v20 = vld [vmem:[%s4095_s7 + $0x38] sm:$0xff]  }
 0x2eb   : > { %v1894_v23 = vrot.slane %v1745_v14, %v3926_v40 }
 0x2ec   : > { %v1979_v0 = vsel %vm1895_vm0, %v1978_v28, %v1974_v12 }
 0x2ed   : > { %v1796_v32 = vpop.permute.xlu1 %1795  ;;  %v1896_v22 = vsel %vm1895_vm0, %v1894_v23, %v1889_v9 }
 0x2ee   : > { %v1748_v54 = vpop.permute.xlu0 %1747  ;;  %v1983_v15 = vrot.slane %v1796_v32, %v3932_v49 }
 0x2ef   : > { %v1901_v17 = vrot.slane %v1748_v54, %v3932_v49 }
 0x2f0   : > { %v1984_v19 = vsel %vm1902_vm1, %v1983_v15, %v1979_v0 }
 0x2f1   : > { %v1799_v21 = vpop.permute.xlu1 %1798  ;;  %v1903_v16 = vsel %vm1902_vm1, %v1901_v17, %v1896_v22 }
 0x2f2   : > { %v1988_v1 = vrot.slane %v1799_v21, %v1907_v50  ;;  %v1751_v45 = vpop.permute.xlu0 %1750 }
 0x2f3   : > { %v1908_v40 = vrot.slane %v1751_v45, %v1907_v50  ;;  %v2642_v50 = vld [vmem:[%s4095_s7 + $0x10] sm:$0xff]  }
 0x2f4   : > { %v1989_v26 = vsel %vm1909_vm2, %v1988_v1, %v1984_v19 }
 0x2f5   : > { %v1910_v25 = vsel %vm1909_vm2, %v1908_v40, %v1903_v16 }
 0x2f6   : > { %v1991_v42 = vsel %vm1990_vm4, %v1989_v26, %v1910_v25 }
 0x2f7   : > { %v1992_v49 = vpack.c.b16 %v1991_v42, %v1991_v42 }
 0x2f9   : > { %2508 = vmatmul.mubr.bf16.vlgmr.msra.gmra.mrb[0].mxu0 %v1992_v49 }
 0x2fa   : > { %2547 = vmatprep.mubr.msk.bf16.mxu0 %vm2739_vm3, %v2738_v2  ;;  %2532 = vmatpush3.bf16.msra.mxu0 %v2640_v29 }
 0x2fb   : > { %2533 = vmatprep.subr.bf16.mxu0 %v2738_v2 }
 0x2fe   : > { %2534 = vmatpush3.bf16.msra.mxu0 %v2641_v55 }
 0x2ff   : > { %2535 = vmatprep.subr.bf16.mxu0 %v2738_v2 }
 0x302   : > { %2536 = vmatpush3.bf16.msra.mxu0 %v2642_v50 }
 0x303   : > { %2537 = vmatprep.subr.bf16.mxu0 %v2738_v2 }
 0x306   : > { %2538 = vmatpush3.bf16.msra.mxu0 %v2643_v63 }
 0x307   : > { %2539 = vmatprep.subr.bf16.mxu0 %v2738_v2 }
 0x30a   : > { %2540 = vmatpush3.bf16.msra.mxu0 %v2644_v13 }
 0x30b   : > { %2541 = vmatprep.subr.bf16.mxu0 %v2738_v2 }
 0x30e   : > { %2542 = vmatpush3.bf16.msra.mxu0 %v2645_v52 }
 0x30f   : > { %2543 = vmatprep.subr.bf16.mxu0 %v2738_v2 }
 0x312   : > { %2544 = vmatpush3.bf16.msra.mxu0 %v2646_v6 }
 0x313   : > { %2545 = vmatprep.subr.bf16.mxu0 %v2738_v2  ;;  %v2451_v2 = vld [vmem:[%s4096_s8] ss:$0 sm:$0xff] }
 0x316   : > { %2546 = vmatpush3.bf16.msra.mxu0 %v2647_v20 }
 0x3cc   : > { %v2076_v51 = vpop.f32.mrb[0].mxu0 }
 0x3cd   : > { %v2077_v10 = vadd.f32 %v2433_v57, %v2076_v51  ;;  %v2509_v43 = vpop.f32.mrb[1].mxu0 }
 0x3ce   : > { %v2079_v56 = vpop.f32.mrb[2].mxu0 }
 0x3cf   : > { %v2082_v48 = vmax.f32 %v2077_v10, 0.0  ;;  %v2510_v62 = vpop.f32.mrb[3].mxu0 }
 0x3d1   : > { %v2083_v30 = vpack.c.bf16 %v2082_v48, %v2082_v48 }
 0x3d3   : > { %2528 = vmatmul.mubr.bf16.vlgmr.msra.gmra.mrb[0].mxu1 %v2083_v30 }
 0x4a6   : > { %v2189_v31 = vpop.f32.mrb[0].mxu1 }
 0x4a7   : > { %v2190_v11 = vadd.f32 %v2442_v61, %v2189_v31  ;;  %v2529_v39 = vpop.f32.mrb[1].mxu1 }
 0x4a8   : > { %v2192_v14 = vpop.f32.mrb[2].mxu1 }
 0x4a9   : > { %v2195_v36 = vmax.f32 %v2190_v11, 0.0  ;;  %v2530_v53 = vpop.f32.mrb[3].mxu1 }
 0x4ab   : > { %v2196_v37 = vpack.c.bf16 %v2195_v36, %v2195_v36 }
 0x4ad   : > { %2548 = vmatmul.mubr.bf16.vlgmr.msra.gmra.mrb[4].mxu0 %v2196_v37 }
 0x580   : > { %v2302_v24 = vpop.f32.mrb[4].mxu0 }
 0x581   : > { %v2303_v47 = vadd.f32 %v2451_v2, %v2302_v24  ;;  %v2549_v34 = vpop.f32.mrb[5].mxu0 }
 0x582   : > { %v2305_v41 = vpop.f32.mrb[6].mxu0 }
 0x583   : > { %2308 = vst [vmem:[#allocation5] sm:$0x3] %v2303_v47  ;;  %v2550_v33 = vpop.f32.mrb[7].mxu0 }
 0x584 PF: > { %s4174_s20 = sadd.s32 4294967295, %s2732_s15   ;;  %s2740_s11 = smov [#allocation5]  }
 0x585   : > { %p4041_p4 = scmp.eq.s32.totalorder %s4174_s20, 5  ;;  %s2316_s12 = sshll.u32 %s2740_s11, 4  ;;  %s2317_s12 = int_to_ptr.vmem [resolvable:$true] %s2316_s12 }
 0x586   : > { %s2648_s22 = scalar_lea.vmem %s2317_s12, 32  ;;  %p2655_p8 = scmp.lt.s32.totalorder %s2317_s12, %s2317_s12 }
 0x587   : > { %p2649_p5 = scmp.ne.s32.totalorder %s2317_s12, %s2648_s22  ;;  %p2656_p9 = scmp.lt.s32.totalorder %s2648_s22, %s2648_s22 }
 0x589   : > { %p2650_p6 = pnand %p2649_p5, %p4041_p4  ;;  %p2657_p10 = por %p2656_p9, %p2655_p8 }
 0x58b   : > { %p2651_p7 = pneg %p2650_p6 }
 0x58d   : > { %p2658_p11 = pnand %p2657_p10, %p2651_p7 }
 0x58f   : > { %2661 = shalt.err (!%p2658_p11)
}
 0x590   : > { %s2662_s24 = scalar_lea.hbm %s4097_s9, 32 }
 0x591   : > { %p2663_p12 = scmp.ne.s32.totalorder %s4097_s9, %s2662_s24  ;;  %p2668_p1 = scmp.lt.u32.totalorder %s2662_s24, %s4097_s9 }
 0x593   : > { %p2664_p13 = pnand %p2663_p12, %p4041_p4 }
 0x595   : > { %p2665_p0 = pneg %p2664_p13 }
 0x597   : > { %p2670_p2 = pnand %p2668_p1, %p2665_p0 }
 0x599   : > { %2673 = shalt.err (!%p2670_p2)
}
 0x59a   : > { %2552 = dma.vmem_to_hbm [thread:$0]  (%p4041_p4), %s2317_s12, 32, %s4097_s9, [#allocation6]  }
 0x59b   : > { %2703 = dma.done.wait (%p4041_p4), [#allocation6], 32  }
 0x59c   : > { %2705 = vsyncadd (%p4041_p4), [#allocation6], 4294967264 }
 0x59d PF: > { %s20_s15 = sadd.s32 1, %s2732_s15   ;;  %s4176_s30 = smov %s2712_s10 }
 0x59e   : > { %p17_p3 = scmp.ge.s32.totalorder %s20_s15, 8   ;;  %s4177_s10 = smov %s2843_s23 }
 0x59f   : > { %s4178_s11 = smov %s2724_s13  ;;  %s4179_s12 = smov %s2728_s14 }
 0x5a0   : > { %s4180_s13 = smov %s4183_s17  ;;  %s4181_s14 = smov %s4187_s18 }
 0x5a1   :  { %19 = sbr.rel (!%p17_p3) target bundleno = 4 (0x4), region = 141 }
 0x5a8   :  { %2329 = vsyncpa [#allocation6], 1 }
 0x5a9   :  { %2331 = vsyncpa [#allocation6 + $0x1], 1 }

</bundles_post_ra>
